<compile_context>
chip_gen: v7x
topology: tpu7x:2x2x1
jax: 0.10.0
libtpu: 0.0.40
codegen_flags: <defaults>
</compile_context>

<pallas_src>
import jax
import jax.numpy as jnp
from jax.experimental import pallas as pl
from jax.experimental.pallas import tpu as pltpu

# ---------------- hyperparameters ("hp") ------------------
EMB_DIM = 32
ENC_HID = 32
DEC_HID = 32
NUM_LAYERS = 1   # encoder returns hidden_state.unsqueeze(0) => decoder GRU has 1 layer
DROPOUT = 0.0


# ---------------- GRU gate math (PyTorch order: r, z, n), input proj precomputed ----
def _gru_gates(gi, gh, h):
    hw = gi.shape[1] // 3
    r = jax.nn.sigmoid(gi[:, :hw] + gh[:, :hw])
    z = jax.nn.sigmoid(gi[:, hw:2 * hw] + gh[:, hw:2 * hw])
    n = jnp.tanh(gi[:, 2 * hw:] + r * gh[:, 2 * hw:])
    return (1.0 - z) * n + z * h


# ---------------- fused encoder + single-decoder-step kernel -------------------------
def seq2seq_kernel(
    # inputs (7)
    emb_pair_ref, maskf_ref, emb_dec_ref,
    p_enc_ref, p_att_ref, p_dec_ref, p_out_ref,
    # outputs (3)
    logits_ref, hnew_ref, attw_ref,
    # scratch (VMEM)
    gi_ref, out_ref,
):
    SB, twoE = emb_pair_ref.shape
    B, E = emb_dec_ref.shape
    S = SB // B
    H2 = maskf_ref.shape[1]            # 2 * enc_hidden
    H = H2 // 2
    Hd = p_att_ref.shape[1]            # dec_hidden
    f32 = jnp.float32

    # ---- packed parameter views (all 8-aligned static row slices) ------------------
    w_ih = p_enc_ref[0:twoE, :]                        # (2E, 6H) fused fwd/bwd input proj
    w_hh = p_enc_ref[twoE:twoE + H2, :]                # (2H, 6H) block-structured recurrent
    b_enc = p_enc_ref[twoE + H2:twoE + H2 + 2, :]      # rows: b_ih, b_hh
    b_ih, b_hh = b_enc[0:1, :], b_enc[1:2, :]

    w_fc = p_att_ref[0:H2, :]                          # encoder fc (cat(h_f, h_b) -> Hd)
    w_att_enc = p_att_ref[H2:2 * H2, :]                # attention W, encoder-output rows
    w_att_h = p_att_ref[2 * H2:2 * H2 + Hd, :]         # attention W, decoder-hidden rows
    b_att3 = p_att_ref[2 * H2 + Hd:2 * H2 + Hd + 3, :]
    b_fc, b_att, v_row = b_att3[0:1, :], b_att3[1:2, :], b_att3[2:3, :]

    Dd = E + H2
    w_d_ih = p_dec_ref[0:Dd, :]                        # decoder GRU input weights (cat rows)
    w_d_hh = p_dec_ref[Dd:Dd + Hd, :]
    b_dec2 = p_dec_ref[Dd + Hd:Dd + Hd + 2, :]
    b_d_ih, b_d_hh = b_dec2[0:1, :], b_dec2[1:2, :]

    Do = E + H2 + Hd
    w_out = p_out_ref[0:Do, :]                         # fc_out weights (cat rows, padded V)
    b_out = p_out_ref[Do:Do + 1, :]

    # ---- hoisted encoder input projection for BOTH directions (one matmul) ---------
    gi_ref[...] = jnp.dot(emb_pair_ref[...], w_ih, preferred_element_type=f32) + b_ih

    # ---- fused bidirectional masked GRU sweep (fwd at t=i, bwd at t=S-1-i) ---------
    h = jnp.zeros((B, H2), f32)                        # [h_fwd | h_bwd]
    for i in range(S):
        tb = S - 1 - i
        gi = gi_ref[i * B:(i + 1) * B, :]              # (B, 6H)
        m = maskf_ref[i * B:(i + 1) * B, :]            # (B, 2H): [valid(i) | valid(S-1-i)]
        gh = jnp.dot(h, w_hh, preferred_element_type=f32) + b_hh
        h_new = _gru_gates(gi, gh, h)
        h = m * h_new + (1.0 - m) * h                  # carry hidden across pads
        out = m * h                                    # padded outputs are zero
        out_ref[i * B:(i + 1) * B, 0:H] = out[:, 0:H]          # fwd half -> time i
        out_ref[tb * B:(tb + 1) * B, H:H2] = out[:, H:H2]      # bwd half -> time S-1-i

    # ---- hidden_state = tanh(fc(cat(h_fwd, h_bwd))) ---------------------------------
    h0 = jnp.tanh(jnp.dot(h, w_fc, preferred_element_type=f32) + b_fc)      # (B, Hd)

    # ---- Bahdanau attention: scores assembled lane-dense as (B, S) ------------------
    proj_e = jnp.dot(out_ref[...], w_att_enc, preferred_element_type=f32)   # (S*B, Hd)
    proj_h = jnp.dot(h0, w_att_h, preferred_element_type=f32) + b_att       # (B, Hd)
    cols = []
    for t in range(S):
        e_t = jnp.tanh(proj_e[t * B:(t + 1) * B, :] + proj_h)               # (B, Hd)
        s_t = jnp.sum(e_t * v_row, axis=-1, keepdims=True)                  # (B, 1)
        m_t = maskf_ref[t * B:(t + 1) * B, 0:1]                             # valid(b, t)
        cols.append(jnp.where(m_t > 0.5, s_t, -1.0e10))
    score = jnp.concatenate(cols, axis=1)                                   # (B, S)
    score = score - jnp.max(score, axis=-1, keepdims=True)                  # lane reduce
    expw = jnp.exp(score)
    attw = expw / jnp.sum(expw, axis=-1, keepdims=True)                     # (B, S)
    attw_ref[...] = attw                                                    # direct (B,S) store

    ctx = jnp.zeros((B, H2), f32)                                           # [ctx_f | ctx_b]
    for t in range(S):
        ctx = ctx + attw[:, t:t + 1] * out_ref[t * B:(t + 1) * B, :]

    # ---- decoder GRU cell on cat(embedded, context): one K=96 matmul ----------------
    emb_d = emb_dec_ref[...]
    x_d = jnp.concatenate([emb_d, ctx], axis=1)                             # (B, E+2H)
    gi_d = jnp.dot(x_d, w_d_ih, preferred_element_type=f32) + b_d_ih
    gh_d = jnp.dot(h0, w_d_hh, preferred_element_type=f32) + b_d_hh
    hn = _gru_gates(gi_d, gh_d, h0)                                         # (B, Hd)

    # ---- fc_out(cat(embedded, context, decoder_hidden)): one K=128 matmul -----------
    x_o = jnp.concatenate([emb_d, ctx, hn], axis=1)                         # (B, 128)
    logits_ref[...] = jnp.dot(x_o, w_out, preferred_element_type=f32) + b_out
    hnew_ref[...] = hn


# ---------------- wrapper ------------------------------------------------------------
def _vmem_spec():
    return pl.BlockSpec(memory_space=pltpu.MemorySpace.VMEM)


def seq2seq_forward(params, src, src_len, start_token, *, trg_vocab):
    # TODO(synk): decodingModule is an arbitrary runtime callable in the PyTorch code;
    # here it is specialized to a single greedy decoder step from a fixed start token,
    # fused with the encoder into one Pallas kernel.
    B0, S = src.shape
    E, H, Hd = EMB_DIM, ENC_HID, DEC_HID
    H2 = 2 * H
    Vp = params["p_out"].shape[1]
    Bp = ((B0 + 7) // 8) * 8                          # pad batch to a sublane multiple

    src_p = jnp.pad(src, ((0, Bp - B0), (0, 0)))
    len_p = jnp.pad(src_len.astype(jnp.int32), (0, Bp - B0))   # padded rows: length 0

    # embeddings + time-reversed copy packed along lanes; row index = t*Bp + b
    emb_src = jnp.take(params["enc_embedding"], jnp.transpose(src_p), axis=0
                       ).astype(jnp.float32)                                 # (S, Bp, E)
    emb_pair = jnp.concatenate([emb_src, emb_src[::-1]], axis=-1
                               ).reshape(S * Bp, 2 * E)                      # (S*Bp, 2E)

    # fused validity mask: lanes [0:H] = valid(t) (fwd), lanes [H:2H] = valid(S-1-t) (bwd)
    valid_f = (jnp.arange(S)[:, None] < len_p[None, :]).astype(jnp.float32)  # (S, Bp)
    mask_fused = jnp.concatenate(
        [jnp.repeat(valid_f[:, :, None], H, axis=-1),
         jnp.repeat(valid_f[::-1][:, :, None], H, axis=-1)], axis=-1
    ).reshape(S * Bp, H2)                                                    # (S*Bp, 2H)

    trg = jnp.full((Bp,), start_token, dtype=jnp.int32)
    emb_dec = jnp.take(params["dec_embedding"], trg, axis=0).astype(jnp.float32)  # (Bp, E)

    inputs = (emb_pair, mask_fused, emb_dec,
              params["p_enc"], params["p_att"], params["p_dec"], params["p_out"])

    logits_p, h_new, attw = pl.pallas_call(
        seq2seq_kernel,
        out_shape=(jax.ShapeDtypeStruct((Bp, Vp), jnp.float32),   # padded logits (lane-dense)
                   jax.ShapeDtypeStruct((Bp, Hd), jnp.float32),   # new decoder hidden
                   jax.ShapeDtypeStruct((Bp, S), jnp.float32)),   # attention weights (B, S)
        in_specs=[_vmem_spec() for _ in range(len(inputs))],
        out_specs=(_vmem_spec(), _vmem_spec(), _vmem_spec()),
        scratch_shapes=[
            pltpu.VMEM((S * Bp, 6 * H), jnp.float32),   # hoisted fused input projection
            pltpu.VMEM((S * Bp, H2), jnp.float32),      # encoder outputs [fwd | bwd]
        ],
    )(*inputs)

    out = logits_p[:B0, :trg_vocab]                   # slice off batch + vocab padding
    hidden_state = h_new[None, :B0, :]                # (1, B, Hd) == unsqueeze(0)
    atten_weights = attw[:B0, :]                      # (B, S), no transpose needed
    return out, hidden_state, atten_weights


# ---------------- deterministic parameter init (kernel-friendly packed layout) -------
def init_params(key, src_vocab, trg_vocab, src_pad_idx, trg_pad_idx):
    E, H, Hd = EMB_DIM, ENC_HID, DEC_HID
    H2, G = 2 * H, 3 * H
    Gd = 3 * Hd
    Vp = ((trg_vocab + 127) // 128) * 128             # pad fc_out columns to 128 lanes

    def nrm(k, shape, scale=0.1):
        return scale * jax.random.normal(k, shape, dtype=jnp.float32)

    ks = iter(jax.random.split(key, 32))
    p = {}
    p["enc_embedding"] = nrm(next(ks), (src_vocab, E)).at[src_pad_idx].set(0.0)
    p["dec_embedding"] = nrm(next(ks), (trg_vocab, E)).at[trg_pad_idx].set(0.0)

    # per-direction encoder GRU weights, gate order (r, z, n), pre-transposed to (in, 3H)
    w_ih_f, w_ih_b = nrm(next(ks), (E, G)), nrm(next(ks), (E, G))
    w_hh_f, w_hh_b = nrm(next(ks), (H, G)), nrm(next(ks), (H, G))
    b_ih_f, b_ih_b = nrm(next(ks), (1, G)), nrm(next(ks), (1, G))
    b_hh_f, b_hh_b = nrm(next(ks), (1, G)), nrm(next(ks), (1, G))

    def fuse_cols(wf, wb):
        # fwd rows feed only fwd gate columns, bwd rows only bwd gate columns;
        # fused column layout per gate g: [g_fwd(H) | g_bwd(H)]  ->  (Kf+Kb, 6H)
        kf = wf.shape[0]
        out = jnp.zeros((kf + wb.shape[0], 2 * G), jnp.float32)
        for g in range(3):
            out = out.at[:kf, 2 * g * H:(2 * g + 1) * H].set(wf[:, g * H:(g + 1) * H])
            out = out.at[kf:, (2 * g + 1) * H:(2 * g + 2) * H].set(wb[:, g * H:(g + 1) * H])
        return out

    def fuse_bias(bf, bb):
        cols = []
        for g in range(3):
            cols += [bf[:, g * H:(g + 1) * H], bb[:, g * H:(g + 1) * H]]
        return jnp.concatenate(cols, axis=1)          # (1, 6H)

    p["p_enc"] = jnp.concatenate(
        [fuse_cols(w_ih_f, w_ih_b),                   # rows [0 : 2E)       input proj
         fuse_cols(w_hh_f, w_hh_b),                   # rows [2E : 2E+2H)   recurrent
         fuse_bias(b_ih_f, b_ih_b),                   # row  2E+2H          b_ih
         fuse_bias(b_hh_f, b_hh_b)], axis=0)          # row  2E+2H+1        b_hh

    # encoder fc + attention (all Hd output columns)
    w_fc = nrm(next(ks), (H2, Hd)); b_fc = nrm(next(ks), (1, Hd))
    w_att_enc = nrm(next(ks), (H2, Hd)); w_att_h = nrm(next(ks), (Hd, Hd))
    b_att = nrm(next(ks), (1, Hd)); v = nrm(next(ks), (1, Hd))
    p["p_att"] = jnp.concatenate([w_fc, w_att_enc, w_att_h, b_fc, b_att, v], axis=0)

    # decoder GRU: input = cat(emb, ctx_fwd, ctx_bwd), gate order (r, z, n)
    w_d_ih = nrm(next(ks), (E + H2, Gd)); w_d_hh = nrm(next(ks), (Hd, Gd))
    b_d_ih = nrm(next(ks), (1, Gd)); b_d_hh = nrm(next(ks), (1, Gd))
    p["p_dec"] = jnp.concatenate([w_d_ih, w_d_hh, b_d_ih, b_d_hh], axis=0)

    # fc_out: input = cat(emb, ctx_fwd, ctx_bwd, h_dec); output columns padded to Vp
    w_out = jnp.pad(nrm(next(ks), (E + H2 + Hd, trg_vocab)), ((0, 0), (0, Vp - trg_vocab)))
    b_out = jnp.pad(nrm(next(ks), (1, trg_vocab)), ((0, 0), (0, Vp - trg_vocab)))
    p["p_out"] = jnp.concatenate([w_out, b_out], axis=0)
    return p


# ---------------- main ----------------------------------------------------------------
if __name__ == "__main__":
    SRC_VOCAB, TRG_VOCAB = 50, 60
    SRC_PAD, TRG_PAD = 0, 0
    B, S = 4, 8

    key = jax.random.PRNGKey(0)
    k_param, k_src = jax.random.split(key)
    params = init_params(k_param, SRC_VOCAB, TRG_VOCAB, SRC_PAD, TRG_PAD)

    src_len = jnp.array([8, 6, 5, 3], dtype=jnp.int32)
    src = jax.random.randint(k_src, (B, S), minval=1, maxval=SRC_VOCAB, dtype=jnp.int32)
    pad_mask = jnp.arange(S)[None, :] < src_len[:, None]
    src = jnp.where(pad_mask, src, SRC_PAD)

    fwd = jax.jit(seq2seq_forward, static_argnames=("trg_vocab",))
    out, hidden_state, atten_weights = fwd(params, src, src_len, 1, trg_vocab=TRG_VOCAB)
    out = jax.block_until_ready(out)
    hidden_state = jax.block_until_ready(hidden_state)
    atten_weights = jax.block_until_ready(atten_weights)

    assert out.shape == (B, TRG_VOCAB)
    assert hidden_state.shape == (1, B, DEC_HID)
    assert atten_weights.shape == (B, S)
    assert bool(jnp.all(jnp.isfinite(out)))
    assert bool(jnp.all(jnp.isfinite(hidden_state)))
    # attention weights sum to 1 over source positions
    assert bool(jnp.all(jnp.abs(jnp.sum(atten_weights, axis=1) - 1.0) < 1e-4))

    print("KERNEL_OK")
</pallas_src>

<mosaic_0001>
module attributes {stable_mosaic.version = 11 : i64} {
  func.func @seq2seq_kernel(%arg0: memref<64x64xf32, #tpu.memory_space<vmem>>, %arg1: memref<64x64xf32, #tpu.memory_space<vmem>>, %arg2: memref<8x32xf32, #tpu.memory_space<vmem>>, %arg3: memref<130x192xf32, #tpu.memory_space<vmem>>, %arg4: memref<163x32xf32, #tpu.memory_space<vmem>>, %arg5: memref<130x96xf32, #tpu.memory_space<vmem>>, %arg6: memref<129x128xf32, #tpu.memory_space<vmem>>, %arg7: memref<8x128xf32, #tpu.memory_space<vmem>>, %arg8: memref<8x32xf32, #tpu.memory_space<vmem>>, %arg9: memref<8x8xf32, #tpu.memory_space<vmem>>, %arg10: memref<64x192xf32, #tpu.memory_space<vmem>>, %arg11: memref<64x64xf32, #tpu.memory_space<vmem>>) attributes {dimension_semantics = [], scalar_prefetch = 0 : i64, scratch_operands = 2 : i64, tpu.core_type = #tpu.core_type<tc>} {
    %c0 = arith.constant 0 : index
    %c0_0 = arith.constant 0 : index
    %0 = vector.load %arg3[%c0, %c0_0] : memref<130x192xf32, #tpu.memory_space<vmem>>, vector<64x192xf32>
    %c64 = arith.constant 64 : index
    %c0_1 = arith.constant 0 : index
    %1 = vector.load %arg3[%c64, %c0_1] : memref<130x192xf32, #tpu.memory_space<vmem>>, vector<64x192xf32>
    %c128 = arith.constant 128 : index
    %c0_2 = arith.constant 0 : index
    %2 = vector.load %arg3[%c128, %c0_2] : memref<130x192xf32, #tpu.memory_space<vmem>>, vector<2x192xf32>
    %3 = vector.extract_strided_slice %2 {offsets = [0, 0], sizes = [1, 192], strides = [1, 1]} : vector<2x192xf32> to vector<1x192xf32>
    %4 = vector.extract_strided_slice %2 {offsets = [1, 0], sizes = [1, 192], strides = [1, 1]} : vector<2x192xf32> to vector<1x192xf32>
    %c0_3 = arith.constant 0 : index
    %c0_4 = arith.constant 0 : index
    %5 = vector.load %arg4[%c0_3, %c0_4] : memref<163x32xf32, #tpu.memory_space<vmem>>, vector<64x32xf32>
    %c64_5 = arith.constant 64 : index
    %c0_6 = arith.constant 0 : index
    %6 = vector.load %arg4[%c64_5, %c0_6] : memref<163x32xf32, #tpu.memory_space<vmem>>, vector<64x32xf32>
    %c128_7 = arith.constant 128 : index
    %c0_8 = arith.constant 0 : index
    %7 = vector.load %arg4[%c128_7, %c0_8] : memref<163x32xf32, #tpu.memory_space<vmem>>, vector<32x32xf32>
    %c160 = arith.constant 160 : index
    %c0_9 = arith.constant 0 : index
    %8 = vector.load %arg4[%c160, %c0_9] : memref<163x32xf32, #tpu.memory_space<vmem>>, vector<3x32xf32>
    %9 = vector.extract_strided_slice %8 {offsets = [0, 0], sizes = [1, 32], strides = [1, 1]} : vector<3x32xf32> to vector<1x32xf32>
    %10 = vector.extract_strided_slice %8 {offsets = [1, 0], sizes = [1, 32], strides = [1, 1]} : vector<3x32xf32> to vector<1x32xf32>
    %11 = vector.extract_strided_slice %8 {offsets = [2, 0], sizes = [1, 32], strides = [1, 1]} : vector<3x32xf32> to vector<1x32xf32>
    %c0_10 = arith.constant 0 : index
    %c0_11 = arith.constant 0 : index
    %12 = vector.load %arg5[%c0_10, %c0_11] : memref<130x96xf32, #tpu.memory_space<vmem>>, vector<96x96xf32>
    %c96 = arith.constant 96 : index
    %c0_12 = arith.constant 0 : index
    %13 = vector.load %arg5[%c96, %c0_12] : memref<130x96xf32, #tpu.memory_space<vmem>>, vector<32x96xf32>
    %c128_13 = arith.constant 128 : index
    %c0_14 = arith.constant 0 : index
    %14 = vector.load %arg5[%c128_13, %c0_14] : memref<130x96xf32, #tpu.memory_space<vmem>>, vector<2x96xf32>
    %15 = vector.extract_strided_slice %14 {offsets = [0, 0], sizes = [1, 96], strides = [1, 1]} : vector<2x96xf32> to vector<1x96xf32>
    %16 = vector.extract_strided_slice %14 {offsets = [1, 0], sizes = [1, 96], strides = [1, 1]} : vector<2x96xf32> to vector<1x96xf32>
    %c0_15 = arith.constant 0 : index
    %c0_16 = arith.constant 0 : index
    %17 = vector.load %arg6[%c0_15, %c0_16] : memref<129x128xf32, #tpu.memory_space<vmem>>, vector<128x128xf32>
    %c128_17 = arith.constant 128 : index
    %c0_18 = arith.constant 0 : index
    %18 = vector.load %arg6[%c128_17, %c0_18] : memref<129x128xf32, #tpu.memory_space<vmem>>, vector<1x128xf32>
    %c0_19 = arith.constant 0 : index
    %c0_20 = arith.constant 0 : index
    %19 = vector.load %arg0[%c0_19, %c0_20] : memref<64x64xf32, #tpu.memory_space<vmem>>, vector<64x64xf32>
    %cst = arith.constant dense<0.000000e+00> : vector<64x192xf32>
    %20 = tpu.matmul %19, %0, %cst {dimension_numbers = #tpu.dot_dimension_numbers<[1], [0], [0], [1], [0, 0, 1, 1], [], []>} : vector<64x64xf32>, vector<64x192xf32>, vector<64x192xf32> -> vector<64x192xf32>
    %21 = vector.broadcast %3 : vector<1x192xf32> to vector<64x192xf32>
    %22 = arith.addf %20, %21 : vector<64x192xf32>
    %c0_21 = arith.constant 0 : index
    %c0_22 = arith.constant 0 : index
    %23 = vector.load %arg10[%c0_21, %c0_22] : memref<64x192xf32, #tpu.memory_space<vmem>>, vector<64x192xf32>
    tpu.vector_store %arg10[%c0_21, %c0_22], %22 {strides = array<i32>} : memref<64x192xf32, #tpu.memory_space<vmem>>, vector<64x192xf32>,
    %cst_23 = arith.constant 0.000000e+00 : f32
    %24 = vector.broadcast %cst_23 : f32 to vector<8x64xf32>
    %c0_24 = arith.constant 0 : index
    %c0_25 = arith.constant 0 : index
    %25 = vector.load %arg10[%c0_24, %c0_25] : memref<64x192xf32, #tpu.memory_space<vmem>>, vector<8x192xf32>
    %c0_26 = arith.constant 0 : index
    %c0_27 = arith.constant 0 : index
    %26 = vector.load %arg1[%c0_26, %c0_27] : memref<64x64xf32, #tpu.memory_space<vmem>>, vector<8x64xf32>
    %cst_28 = arith.constant dense<0.000000e+00> : vector<8x192xf32>
    %27 = tpu.matmul %24, %1, %cst_28 {dimension_numbers = #tpu.dot_dimension_numbers<[1], [0], [0], [1], [0, 0, 1, 1], [], []>} : vector<8x64xf32>, vector<64x192xf32>, vector<8x192xf32> -> vector<8x192xf32>
    %28 = vector.broadcast %4 : vector<1x192xf32> to vector<8x192xf32>
    %29 = arith.addf %27, %28 : vector<8x192xf32>
    %30 = vector.extract_strided_slice %25 {offsets = [0, 0], sizes = [8, 64], strides = [1, 1]} : vector<8x192xf32> to vector<8x64xf32>
    %31 = vector.extract_strided_slice %29 {offsets = [0, 0], sizes = [8, 64], strides = [1, 1]} : vector<8x192xf32> to vector<8x64xf32>
    %32 = arith.addf %30, %31 : vector<8x64xf32>
    %33 = arith.negf %32 : vector<8x64xf32>
    %34 = math.exp %33 : vector<8x64xf32>
    %cst_29 = arith.constant 1.000000e+00 : f32
    %35 = vector.broadcast %cst_29 : f32 to vector<8x64xf32>
    %36 = arith.addf %35, %34 : vector<8x64xf32>
    %37 = arith.divf %35, %36 : vector<8x64xf32>
    %38 = vector.extract_strided_slice %25 {offsets = [0, 64], sizes = [8, 64], strides = [1, 1]} : vector<8x192xf32> to vector<8x64xf32>
    %39 = vector.extract_strided_slice %29 {offsets = [0, 64], sizes = [8, 64], strides = [1, 1]} : vector<8x192xf32> to vector<8x64xf32>
    %40 = arith.addf %38, %39 : vector<8x64xf32>
    %41 = arith.negf %40 : vector<8x64xf32>
    %42 = math.exp %41 : vector<8x64xf32>
    %cst_30 = arith.constant 1.000000e+00 : f32
    %43 = vector.broadcast %cst_30 : f32 to vector<8x64xf32>
    %44 = arith.addf %43, %42 : vector<8x64xf32>
    %45 = arith.divf %43, %44 : vector<8x64xf32>
    %46 = vector.extract_strided_slice %25 {offsets = [0, 128], sizes = [8, 64], strides = [1, 1]} : vector<8x192xf32> to vector<8x64xf32>
    %47 = vector.extract_strided_slice %29 {offsets = [0, 128], sizes = [8, 64], strides = [1, 1]} : vector<8x192xf32> to vector<8x64xf32>
    %48 = arith.mulf %37, %47 : vector<8x64xf32>
    %49 = arith.addf %46, %48 : vector<8x64xf32>
    %50 = math.tanh %49 : vector<8x64xf32>
    %cst_31 = arith.constant 1.000000e+00 : f32
    %51 = vector.broadcast %cst_31 : f32 to vector<8x64xf32>
    %52 = arith.subf %51, %45 : vector<8x64xf32>
    %53 = arith.mulf %52, %50 : vector<8x64xf32>
    %54 = arith.mulf %45, %24 : vector<8x64xf32>
    %55 = arith.addf %53, %54 : vector<8x64xf32>
    %56 = arith.mulf %26, %55 : vector<8x64xf32>
    %cst_32 = arith.constant 1.000000e+00 : f32
    %57 = vector.broadcast %cst_32 : f32 to vector<8x64xf32>
    %58 = arith.subf %57, %26 : vector<8x64xf32>
    %59 = arith.mulf %58, %24 : vector<8x64xf32>
    %60 = arith.addf %56, %59 : vector<8x64xf32>
    %61 = arith.mulf %26, %60 : vector<8x64xf32>
    %62 = vector.extract_strided_slice %61 {offsets = [0, 0], sizes = [8, 32], strides = [1, 1]} : vector<8x64xf32> to vector<8x32xf32>
    %c0_33 = arith.constant 0 : index
    %c0_34 = arith.constant 0 : index
    %63 = vector.load %arg11[%c0_33, %c0_34] : memref<64x64xf32, #tpu.memory_space<vmem>>, vector<8x32xf32>
    tpu.vector_store %arg11[%c0_33, %c0_34], %62 {strides = array<i32>} : memref<64x64xf32, #tpu.memory_space<vmem>>, vector<8x32xf32>,
    %64 = vector.extract_strided_slice %61 {offsets = [0, 32], sizes = [8, 32], strides = [1, 1]} : vector<8x64xf32> to vector<8x32xf32>
    %c56 = arith.constant 56 : index
    %c32 = arith.constant 32 : index
    %65 = vector.load %arg11[%c56, %c32] : memref<64x64xf32, #tpu.memory_space<vmem>>, vector<8x32xf32>
    tpu.vector_store %arg11[%c56, %c32], %64 {strides = array<i32>} : memref<64x64xf32, #tpu.memory_space<vmem>>, vector<8x32xf32>,
    %c8 = arith.constant 8 : index
    %c0_35 = arith.constant 0 : index
    %66 = vector.load %arg10[%c8, %c0_35] : memref<64x192xf32, #tpu.memory_space<vmem>>, vector<8x192xf32>
    %c8_36 = arith.constant 8 : index
    %c0_37 = arith.constant 0 : index
    %67 = vector.load %arg1[%c8_36, %c0_37] : memref<64x64xf32, #tpu.memory_space<vmem>>, vector<8x64xf32>
    %cst_38 = arith.constant dense<0.000000e+00> : vector<8x192xf32>
    %68 = tpu.matmul %60, %1, %cst_38 {dimension_numbers = #tpu.dot_dimension_numbers<[1], [0], [0], [1], [0, 0, 1, 1], [], []>} : vector<8x64xf32>, vector<64x192xf32>, vector<8x192xf32> -> vector<8x192xf32>
    %69 = vector.broadcast %4 : vector<1x192xf32> to vector<8x192xf32>
    %70 = arith.addf %68, %69 : vector<8x192xf32>
    %71 = vector.extract_strided_slice %66 {offsets = [0, 0], sizes = [8, 64], strides = [1, 1]} : vector<8x192xf32> to vector<8x64xf32>
    %72 = vector.extract_strided_slice %70 {offsets = [0, 0], sizes = [8, 64], strides = [1, 1]} : vector<8x192xf32> to vector<8x64xf32>
    %73 = arith.addf %71, %72 : vector<8x64xf32>
    %74 = arith.negf %73 : vector<8x64xf32>
    %75 = math.exp %74 : vector<8x64xf32>
    %cst_39 = arith.constant 1.000000e+00 : f32
    %76 = vector.broadcast %cst_39 : f32 to vector<8x64xf32>
    %77 = arith.addf %76, %75 : vector<8x64xf32>
    %78 = arith.divf %76, %77 : vector<8x64xf32>
    %79 = vector.extract_strided_slice %66 {offsets = [0, 64], sizes = [8, 64], strides = [1, 1]} : vector<8x192xf32> to vector<8x64xf32>
    %80 = vector.extract_strided_slice %70 {offsets = [0, 64], sizes = [8, 64], strides = [1, 1]} : vector<8x192xf32> to vector<8x64xf32>
    %81 = arith.addf %79, %80 : vector<8x64xf32>
    %82 = arith.negf %81 : vector<8x64xf32>
    %83 = math.exp %82 : vector<8x64xf32>
    %cst_40 = arith.constant 1.000000e+00 : f32
    %84 = vector.broadcast %cst_40 : f32 to vector<8x64xf32>
    %85 = arith.addf %84, %83 : vector<8x64xf32>
    %86 = arith.divf %84, %85 : vector<8x64xf32>
    %87 = vector.extract_strided_slice %66 {offsets = [0, 128], sizes = [8, 64], strides = [1, 1]} : vector<8x192xf32> to vector<8x64xf32>
    %88 = vector.extract_strided_slice %70 {offsets = [0, 128], sizes = [8, 64], strides = [1, 1]} : vector<8x192xf32> to vector<8x64xf32>
    %89 = arith.mulf %78, %88 : vector<8x64xf32>
    %90 = arith.addf %87, %89 : vector<8x64xf32>
    %91 = math.tanh %90 : vector<8x64xf32>
    %cst_41 = arith.constant 1.000000e+00 : f32
    %92 = vector.broadcast %cst_41 : f32 to vector<8x64xf32>
    %93 = arith.subf %92, %86 : vector<8x64xf32>
    %94 = arith.mulf %93, %91 : vector<8x64xf32>
    %95 = arith.mulf %86, %60 : vector<8x64xf32>
    %96 = arith.addf %94, %95 : vector<8x64xf32>
    %97 = arith.mulf %67, %96 : vector<8x64xf32>
    %cst_42 = arith.constant 1.000000e+00 : f32
    %98 = vector.broadcast %cst_42 : f32 to vector<8x64xf32>
    %99 = arith.subf %98, %67 : vector<8x64xf32>
    %100 = arith.mulf %99, %60 : vector<8x64xf32>
    %101 = arith.addf %97, %100 : vector<8x64xf32>
    %102 = arith.mulf %67, %101 : vector<8x64xf32>
    %103 = vector.extract_strided_slice %102 {offsets = [0, 0], sizes = [8, 32], strides = [1, 1]} : vector<8x64xf32> to vector<8x32xf32>
    %c8_43 = arith.constant 8 : index
    %c0_44 = arith.constant 0 : index
    %104 = vector.load %arg11[%c8_43, %c0_44] : memref<64x64xf32, #tpu.memory_space<vmem>>, vector<8x32xf32>
    tpu.vector_store %arg11[%c8_43, %c0_44], %103 {strides = array<i32>} : memref<64x64xf32, #tpu.memory_space<vmem>>, vector<8x32xf32>,
    %105 = vector.extract_strided_slice %102 {offsets = [0, 32], sizes = [8, 32], strides = [1, 1]} : vector<8x64xf32> to vector<8x32xf32>
    %c48 = arith.constant 48 : index
    %c32_45 = arith.constant 32 : index
    %106 = vector.load %arg11[%c48, %c32_45] : memref<64x64xf32, #tpu.memory_space<vmem>>, vector<8x32xf32>
    tpu.vector_store %arg11[%c48, %c32_45], %105 {strides = array<i32>} : memref<64x64xf32, #tpu.memory_space<vmem>>, vector<8x32xf32>,
    %c16 = arith.constant 16 : index
    %c0_46 = arith.constant 0 : index
    %107 = vector.load %arg10[%c16, %c0_46] : memref<64x192xf32, #tpu.memory_space<vmem>>, vector<8x192xf32>
    %c16_47 = arith.constant 16 : index
    %c0_48 = arith.constant 0 : index
    %108 = vector.load %arg1[%c16_47, %c0_48] : memref<64x64xf32, #tpu.memory_space<vmem>>, vector<8x64xf32>
    %cst_49 = arith.constant dense<0.000000e+00> : vector<8x192xf32>
    %109 = tpu.matmul %101, %1, %cst_49 {dimension_numbers = #tpu.dot_dimension_numbers<[1], [0], [0], [1], [0, 0, 1, 1], [], []>} : vector<8x64xf32>, vector<64x192xf32>, vector<8x192xf32> -> vector<8x192xf32>
    %110 = vector.broadcast %4 : vector<1x192xf32> to vector<8x192xf32>
    %111 = arith.addf %109, %110 : vector<8x192xf32>
    %112 = vector.extract_strided_slice %107 {offsets = [0, 0], sizes = [8, 64], strides = [1, 1]} : vector<8x192xf32> to vector<8x64xf32>
    %113 = vector.extract_strided_slice %111 {offsets = [0, 0], sizes = [8, 64], strides = [1, 1]} : vector<8x192xf32> to vector<8x64xf32>
    %114 = arith.addf %112, %113 : vector<8x64xf32>
    %115 = arith.negf %114 : vector<8x64xf32>
    %116 = math.exp %115 : vector<8x64xf32>
    %cst_50 = arith.constant 1.000000e+00 : f32
    %117 = vector.broadcast %cst_50 : f32 to vector<8x64xf32>
    %118 = arith.addf %117, %116 : vector<8x64xf32>
    %119 = arith.divf %117, %118 : vector<8x64xf32>
    %120 = vector.extract_strided_slice %107 {offsets = [0, 64], sizes = [8, 64], strides = [1, 1]} : vector<8x192xf32> to vector<8x64xf32>
    %121 = vector.extract_strided_slice %111 {offsets = [0, 64], sizes = [8, 64], strides = [1, 1]} : vector<8x192xf32> to vector<8x64xf32>
    %122 = arith.addf %120, %121 : vector<8x64xf32>
    %123 = arith.negf %122 : vector<8x64xf32>
    %124 = math.exp %123 : vector<8x64xf32>
    %cst_51 = arith.constant 1.000000e+00 : f32
    %125 = vector.broadcast %cst_51 : f32 to vector<8x64xf32>
    %126 = arith.addf %125, %124 : vector<8x64xf32>
    %127 = arith.divf %125, %126 : vector<8x64xf32>
    %128 = vector.extract_strided_slice %107 {offsets = [0, 128], sizes = [8, 64], strides = [1, 1]} : vector<8x192xf32> to vector<8x64xf32>
    %129 = vector.extract_strided_slice %111 {offsets = [0, 128], sizes = [8, 64], strides = [1, 1]} : vector<8x192xf32> to vector<8x64xf32>
    %130 = arith.mulf %119, %129 : vector<8x64xf32>
    %131 = arith.addf %128, %130 : vector<8x64xf32>
    %132 = math.tanh %131 : vector<8x64xf32>
    %cst_52 = arith.constant 1.000000e+00 : f32
    %133 = vector.broadcast %cst_52 : f32 to vector<8x64xf32>
    %134 = arith.subf %133, %127 : vector<8x64xf32>
    %135 = arith.mulf %134, %132 : vector<8x64xf32>
    %136 = arith.mulf %127, %101 : vector<8x64xf32>
    %137 = arith.addf %135, %136 : vector<8x64xf32>
    %138 = arith.mulf %108, %137 : vector<8x64xf32>
    %cst_53 = arith.constant 1.000000e+00 : f32
    %139 = vector.broadcast %cst_53 : f32 to vector<8x64xf32>
    %140 = arith.subf %139, %108 : vector<8x64xf32>
    %141 = arith.mulf %140, %101 : vector<8x64xf32>
    %142 = arith.addf %138, %141 : vector<8x64xf32>
    %143 = arith.mulf %108, %142 : vector<8x64xf32>
    %144 = vector.extract_strided_slice %143 {offsets = [0, 0], sizes = [8, 32], strides = [1, 1]} : vector<8x64xf32> to vector<8x32xf32>
    %c16_54 = arith.constant 16 : index
    %c0_55 = arith.constant 0 : index
    %145 = vector.load %arg11[%c16_54, %c0_55] : memref<64x64xf32, #tpu.memory_space<vmem>>, vector<8x32xf32>
    tpu.vector_store %arg11[%c16_54, %c0_55], %144 {strides = array<i32>} : memref<64x64xf32, #tpu.memory_space<vmem>>, vector<8x32xf32>,
    %146 = vector.extract_strided_slice %143 {offsets = [0, 32], sizes = [8, 32], strides = [1, 1]} : vector<8x64xf32> to vector<8x32xf32>
    %c40 = arith.constant 40 : index
    %c32_56 = arith.constant 32 : index
    %147 = vector.load %arg11[%c40, %c32_56] : memref<64x64xf32, #tpu.memory_space<vmem>>, vector<8x32xf32>
    tpu.vector_store %arg11[%c40, %c32_56], %146 {strides = array<i32>} : memref<64x64xf32, #tpu.memory_space<vmem>>, vector<8x32xf32>,
    %c24 = arith.constant 24 : index
    %c0_57 = arith.constant 0 : index
    %148 = vector.load %arg10[%c24, %c0_57] : memref<64x192xf32, #tpu.memory_space<vmem>>, vector<8x192xf32>
    %c24_58 = arith.constant 24 : index
    %c0_59 = arith.constant 0 : index
    %149 = vector.load %arg1[%c24_58, %c0_59] : memref<64x64xf32, #tpu.memory_space<vmem>>, vector<8x64xf32>
    %cst_60 = arith.constant dense<0.000000e+00> : vector<8x192xf32>
    %150 = tpu.matmul %142, %1, %cst_60 {dimension_numbers = #tpu.dot_dimension_numbers<[1], [0], [0], [1], [0, 0, 1, 1], [], []>} : vector<8x64xf32>, vector<64x192xf32>, vector<8x192xf32> -> vector<8x192xf32>
    %151 = vector.broadcast %4 : vector<1x192xf32> to vector<8x192xf32>
    %152 = arith.addf %150, %151 : vector<8x192xf32>
    %153 = vector.extract_strided_slice %148 {offsets = [0, 0], sizes = [8, 64], strides = [1, 1]} : vector<8x192xf32> to vector<8x64xf32>
    %154 = vector.extract_strided_slice %152 {offsets = [0, 0], sizes = [8, 64], strides = [1, 1]} : vector<8x192xf32> to vector<8x64xf32>
    %155 = arith.addf %153, %154 : vector<8x64xf32>
    %156 = arith.negf %155 : vector<8x64xf32>
    %157 = math.exp %156 : vector<8x64xf32>
    %cst_61 = arith.constant 1.000000e+00 : f32
    %158 = vector.broadcast %cst_61 : f32 to vector<8x64xf32>
    %159 = arith.addf %158, %157 : vector<8x64xf32>
    %160 = arith.divf %158, %159 : vector<8x64xf32>
    %161 = vector.extract_strided_slice %148 {offsets = [0, 64], sizes = [8, 64], strides = [1, 1]} : vector<8x192xf32> to vector<8x64xf32>
    %162 = vector.extract_strided_slice %152 {offsets = [0, 64], sizes = [8, 64], strides = [1, 1]} : vector<8x192xf32> to vector<8x64xf32>
    %163 = arith.addf %161, %162 : vector<8x64xf32>
    %164 = arith.negf %163 : vector<8x64xf32>
    %165 = math.exp %164 : vector<8x64xf32>
    %cst_62 = arith.constant 1.000000e+00 : f32
    %166 = vector.broadcast %cst_62 : f32 to vector<8x64xf32>
    %167 = arith.addf %166, %165 : vector<8x64xf32>
    %168 = arith.divf %166, %167 : vector<8x64xf32>
    %169 = vector.extract_strided_slice %148 {offsets = [0, 128], sizes = [8, 64], strides = [1, 1]} : vector<8x192xf32> to vector<8x64xf32>
    %170 = vector.extract_strided_slice %152 {offsets = [0, 128], sizes = [8, 64], strides = [1, 1]} : vector<8x192xf32> to vector<8x64xf32>
    %171 = arith.mulf %160, %170 : vector<8x64xf32>
    %172 = arith.addf %169, %171 : vector<8x64xf32>
    %173 = math.tanh %172 : vector<8x64xf32>
    %cst_63 = arith.constant 1.000000e+00 : f32
    %174 = vector.broadcast %cst_63 : f32 to vector<8x64xf32>
    %175 = arith.subf %174, %168 : vector<8x64xf32>
    %176 = arith.mulf %175, %173 : vector<8x64xf32>
    %177 = arith.mulf %168, %142 : vector<8x64xf32>
    %178 = arith.addf %176, %177 : vector<8x64xf32>
    %179 = arith.mulf %149, %178 : vector<8x64xf32>
    %cst_64 = arith.constant 1.000000e+00 : f32
    %180 = vector.broadcast %cst_64 : f32 to vector<8x64xf32>
    %181 = arith.subf %180, %149 : vector<8x64xf32>
    %182 = arith.mulf %181, %142 : vector<8x64xf32>
    %183 = arith.addf %179, %182 : vector<8x64xf32>
    %184 = arith.mulf %149, %183 : vector<8x64xf32>
    %185 = vector.extract_strided_slice %184 {offsets = [0, 0], sizes = [8, 32], strides = [1, 1]} : vector<8x64xf32> to vector<8x32xf32>
    %c24_65 = arith.constant 24 : index
    %c0_66 = arith.constant 0 : index
    %186 = vector.load %arg11[%c24_65, %c0_66] : memref<64x64xf32, #tpu.memory_space<vmem>>, vector<8x32xf32>
    tpu.vector_store %arg11[%c24_65, %c0_66], %185 {strides = array<i32>} : memref<64x64xf32, #tpu.memory_space<vmem>>, vector<8x32xf32>,
    %187 = vector.extract_strided_slice %184 {offsets = [0, 32], sizes = [8, 32], strides = [1, 1]} : vector<8x64xf32> to vector<8x32xf32>
    %c32_67 = arith.constant 32 : index
    %c32_68 = arith.constant 32 : index
    %188 = vector.load %arg11[%c32_67, %c32_68] : memref<64x64xf32, #tpu.memory_space<vmem>>, vector<8x32xf32>
    tpu.vector_store %arg11[%c32_67, %c32_68], %187 {strides = array<i32>} : memref<64x64xf32, #tpu.memory_space<vmem>>, vector<8x32xf32>,
    %c32_69 = arith.constant 32 : index
    %c0_70 = arith.constant 0 : index
    %189 = vector.load %arg10[%c32_69, %c0_70] : memref<64x192xf32, #tpu.memory_space<vmem>>, vector<8x192xf32>
    %c32_71 = arith.constant 32 : index
    %c0_72 = arith.constant 0 : index
    %190 = vector.load %arg1[%c32_71, %c0_72] : memref<64x64xf32, #tpu.memory_space<vmem>>, vector<8x64xf32>
    %cst_73 = arith.constant dense<0.000000e+00> : vector<8x192xf32>
    %191 = tpu.matmul %183, %1, %cst_73 {dimension_numbers = #tpu.dot_dimension_numbers<[1], [0], [0], [1], [0, 0, 1, 1], [], []>} : vector<8x64xf32>, vector<64x192xf32>, vector<8x192xf32> -> vector<8x192xf32>
    %192 = vector.broadcast %4 : vector<1x192xf32> to vector<8x192xf32>
    %193 = arith.addf %191, %192 : vector<8x192xf32>
    %194 = vector.extract_strided_slice %189 {offsets = [0, 0], sizes = [8, 64], strides = [1, 1]} : vector<8x192xf32> to vector<8x64xf32>
    %195 = vector.extract_strided_slice %193 {offsets = [0, 0], sizes = [8, 64], strides = [1, 1]} : vector<8x192xf32> to vector<8x64xf32>
    %196 = arith.addf %194, %195 : vector<8x64xf32>
    %197 = arith.negf %196 : vector<8x64xf32>
    %198 = math.exp %197 : vector<8x64xf32>
    %cst_74 = arith.constant 1.000000e+00 : f32
    %199 = vector.broadcast %cst_74 : f32 to vector<8x64xf32>
    %200 = arith.addf %199, %198 : vector<8x64xf32>
    %201 = arith.divf %199, %200 : vector<8x64xf32>
    %202 = vector.extract_strided_slice %189 {offsets = [0, 64], sizes = [8, 64], strides = [1, 1]} : vector<8x192xf32> to vector<8x64xf32>
    %203 = vector.extract_strided_slice %193 {offsets = [0, 64], sizes = [8, 64], strides = [1, 1]} : vector<8x192xf32> to vector<8x64xf32>
    %204 = arith.addf %202, %203 : vector<8x64xf32>
    %205 = arith.negf %204 : vector<8x64xf32>
    %206 = math.exp %205 : vector<8x64xf32>
    %cst_75 = arith.constant 1.000000e+00 : f32
    %207 = vector.broadcast %cst_75 : f32 to vector<8x64xf32>
    %208 = arith.addf %207, %206 : vector<8x64xf32>
    %209 = arith.divf %207, %208 : vector<8x64xf32>
    %210 = vector.extract_strided_slice %189 {offsets = [0, 128], sizes = [8, 64], strides = [1, 1]} : vector<8x192xf32> to vector<8x64xf32>
    %211 = vector.extract_strided_slice %193 {offsets = [0, 128], sizes = [8, 64], strides = [1, 1]} : vector<8x192xf32> to vector<8x64xf32>
    %212 = arith.mulf %201, %211 : vector<8x64xf32>
    %213 = arith.addf %210, %212 : vector<8x64xf32>
    %214 = math.tanh %213 : vector<8x64xf32>
    %cst_76 = arith.constant 1.000000e+00 : f32
    %215 = vector.broadcast %cst_76 : f32 to vector<8x64xf32>
    %216 = arith.subf %215, %209 : vector<8x64xf32>
    %217 = arith.mulf %216, %214 : vector<8x64xf32>
    %218 = arith.mulf %209, %183 : vector<8x64xf32>
    %219 = arith.addf %217, %218 : vector<8x64xf32>
    %220 = arith.mulf %190, %219 : vector<8x64xf32>
    %cst_77 = arith.constant 1.000000e+00 : f32
    %221 = vector.broadcast %cst_77 : f32 to vector<8x64xf32>
    %222 = arith.subf %221, %190 : vector<8x64xf32>
    %223 = arith.mulf %222, %183 : vector<8x64xf32>
    %224 = arith.addf %220, %223 : vector<8x64xf32>
    %225 = arith.mulf %190, %224 : vector<8x64xf32>
    %226 = vector.extract_strided_slice %225 {offsets = [0, 0], sizes = [8, 32], strides = [1, 1]} : vector<8x64xf32> to vector<8x32xf32>
    %c32_78 = arith.constant 32 : index
    %c0_79 = arith.constant 0 : index
    %227 = vector.load %arg11[%c32_78, %c0_79] : memref<64x64xf32, #tpu.memory_space<vmem>>, vector<8x32xf32>
    tpu.vector_store %arg11[%c32_78, %c0_79], %226 {strides = array<i32>} : memref<64x64xf32, #tpu.memory_space<vmem>>, vector<8x32xf32>,
    %228 = vector.extract_strided_slice %225 {offsets = [0, 32], sizes = [8, 32], strides = [1, 1]} : vector<8x64xf32> to vector<8x32xf32>
    %c24_80 = arith.constant 24 : index
    %c32_81 = arith.constant 32 : index
    %229 = vector.load %arg11[%c24_80, %c32_81] : memref<64x64xf32, #tpu.memory_space<vmem>>, vector<8x32xf32>
    tpu.vector_store %arg11[%c24_80, %c32_81], %228 {strides = array<i32>} : memref<64x64xf32, #tpu.memory_space<vmem>>, vector<8x32xf32>,
    %c40_82 = arith.constant 40 : index
    %c0_83 = arith.constant 0 : index
    %230 = vector.load %arg10[%c40_82, %c0_83] : memref<64x192xf32, #tpu.memory_space<vmem>>, vector<8x192xf32>
    %c40_84 = arith.constant 40 : index
    %c0_85 = arith.constant 0 : index
    %231 = vector.load %arg1[%c40_84, %c0_85] : memref<64x64xf32, #tpu.memory_space<vmem>>, vector<8x64xf32>
    %cst_86 = arith.constant dense<0.000000e+00> : vector<8x192xf32>
    %232 = tpu.matmul %224, %1, %cst_86 {dimension_numbers = #tpu.dot_dimension_numbers<[1], [0], [0], [1], [0, 0, 1, 1], [], []>} : vector<8x64xf32>, vector<64x192xf32>, vector<8x192xf32> -> vector<8x192xf32>
    %233 = vector.broadcast %4 : vector<1x192xf32> to vector<8x192xf32>
    %234 = arith.addf %232, %233 : vector<8x192xf32>
    %235 = vector.extract_strided_slice %230 {offsets = [0, 0], sizes = [8, 64], strides = [1, 1]} : vector<8x192xf32> to vector<8x64xf32>
    %236 = vector.extract_strided_slice %234 {offsets = [0, 0], sizes = [8, 64], strides = [1, 1]} : vector<8x192xf32> to vector<8x64xf32>
    %237 = arith.addf %235, %236 : vector<8x64xf32>
    %238 = arith.negf %237 : vector<8x64xf32>
    %239 = math.exp %238 : vector<8x64xf32>
    %cst_87 = arith.constant 1.000000e+00 : f32
    %240 = vector.broadcast %cst_87 : f32 to vector<8x64xf32>
    %241 = arith.addf %240, %239 : vector<8x64xf32>
    %242 = arith.divf %240, %241 : vector<8x64xf32>
    %243 = vector.extract_strided_slice %230 {offsets = [0, 64], sizes = [8, 64], strides = [1, 1]} : vector<8x192xf32> to vector<8x64xf32>
    %244 = vector.extract_strided_slice %234 {offsets = [0, 64], sizes = [8, 64], strides = [1, 1]} : vector<8x192xf32> to vector<8x64xf32>
    %245 = arith.addf %243, %244 : vector<8x64xf32>
    %246 = arith.negf %245 : vector<8x64xf32>
    %247 = math.exp %246 : vector<8x64xf32>
    %cst_88 = arith.constant 1.000000e+00 : f32
    %248 = vector.broadcast %cst_88 : f32 to vector<8x64xf32>
    %249 = arith.addf %248, %247 : vector<8x64xf32>
    %250 = arith.divf %248, %249 : vector<8x64xf32>
    %251 = vector.extract_strided_slice %230 {offsets = [0, 128], sizes = [8, 64], strides = [1, 1]} : vector<8x192xf32> to vector<8x64xf32>
    %252 = vector.extract_strided_slice %234 {offsets = [0, 128], sizes = [8, 64], strides = [1, 1]} : vector<8x192xf32> to vector<8x64xf32>
    %253 = arith.mulf %242, %252 : vector<8x64xf32>
    %254 = arith.addf %251, %253 : vector<8x64xf32>
    %255 = math.tanh %254 : vector<8x64xf32>
    %cst_89 = arith.constant 1.000000e+00 : f32
    %256 = vector.broadcast %cst_89 : f32 to vector<8x64xf32>
    %257 = arith.subf %256, %250 : vector<8x64xf32>
    %258 = arith.mulf %257, %255 : vector<8x64xf32>
    %259 = arith.mulf %250, %224 : vector<8x64xf32>
    %260 = arith.addf %258, %259 : vector<8x64xf32>
    %261 = arith.mulf %231, %260 : vector<8x64xf32>
    %cst_90 = arith.constant 1.000000e+00 : f32
    %262 = vector.broadcast %cst_90 : f32 to vector<8x64xf32>
    %263 = arith.subf %262, %231 : vector<8x64xf32>
    %264 = arith.mulf %263, %224 : vector<8x64xf32>
    %265 = arith.addf %261, %264 : vector<8x64xf32>
    %266 = arith.mulf %231, %265 : vector<8x64xf32>
    %267 = vector.extract_strided_slice %266 {offsets = [0, 0], sizes = [8, 32], strides = [1, 1]} : vector<8x64xf32> to vector<8x32xf32>
    %c40_91 = arith.constant 40 : index
    %c0_92 = arith.constant 0 : index
    %268 = vector.load %arg11[%c40_91, %c0_92] : memref<64x64xf32, #tpu.memory_space<vmem>>, vector<8x32xf32>
    tpu.vector_store %arg11[%c40_91, %c0_92], %267 {strides = array<i32>} : memref<64x64xf32, #tpu.memory_space<vmem>>, vector<8x32xf32>,
    %269 = vector.extract_strided_slice %266 {offsets = [0, 32], sizes = [8, 32], strides = [1, 1]} : vector<8x64xf32> to vector<8x32xf32>
    %c16_93 = arith.constant 16 : index
    %c32_94 = arith.constant 32 : index
    %270 = vector.load %arg11[%c16_93, %c32_94] : memref<64x64xf32, #tpu.memory_space<vmem>>, vector<8x32xf32>
    tpu.vector_store %arg11[%c16_93, %c32_94], %269 {strides = array<i32>} : memref<64x64xf32, #tpu.memory_space<vmem>>, vector<8x32xf32>,
    %c48_95 = arith.constant 48 : index
    %c0_96 = arith.constant 0 : index
    %271 = vector.load %arg10[%c48_95, %c0_96] : memref<64x192xf32, #tpu.memory_space<vmem>>, vector<8x192xf32>
    %c48_97 = arith.constant 48 : index
    %c0_98 = arith.constant 0 : index
    %272 = vector.load %arg1[%c48_97, %c0_98] : memref<64x64xf32, #tpu.memory_space<vmem>>, vector<8x64xf32>
    %cst_99 = arith.constant dense<0.000000e+00> : vector<8x192xf32>
    %273 = tpu.matmul %265, %1, %cst_99 {dimension_numbers = #tpu.dot_dimension_numbers<[1], [0], [0], [1], [0, 0, 1, 1], [], []>} : vector<8x64xf32>, vector<64x192xf32>, vector<8x192xf32> -> vector<8x192xf32>
    %274 = vector.broadcast %4 : vector<1x192xf32> to vector<8x192xf32>
    %275 = arith.addf %273, %274 : vector<8x192xf32>
    %276 = vector.extract_strided_slice %271 {offsets = [0, 0], sizes = [8, 64], strides = [1, 1]} : vector<8x192xf32> to vector<8x64xf32>
    %277 = vector.extract_strided_slice %275 {offsets = [0, 0], sizes = [8, 64], strides = [1, 1]} : vector<8x192xf32> to vector<8x64xf32>
    %278 = arith.addf %276, %277 : vector<8x64xf32>
    %279 = arith.negf %278 : vector<8x64xf32>
    %280 = math.exp %279 : vector<8x64xf32>
    %cst_100 = arith.constant 1.000000e+00 : f32
    %281 = vector.broadcast %cst_100 : f32 to vector<8x64xf32>
    %282 = arith.addf %281, %280 : vector<8x64xf32>
    %283 = arith.divf %281, %282 : vector<8x64xf32>
    %284 = vector.extract_strided_slice %271 {offsets = [0, 64], sizes = [8, 64], strides = [1, 1]} : vector<8x192xf32> to vector<8x64xf32>
    %285 = vector.extract_strided_slice %275 {offsets = [0, 64], sizes = [8, 64], strides = [1, 1]} : vector<8x192xf32> to vector<8x64xf32>
    %286 = arith.addf %284, %285 : vector<8x64xf32>
    %287 = arith.negf %286 : vector<8x64xf32>
    %288 = math.exp %287 : vector<8x64xf32>
    %cst_101 = arith.constant 1.000000e+00 : f32
    %289 = vector.broadcast %cst_101 : f32 to vector<8x64xf32>
    %290 = arith.addf %289, %288 : vector<8x64xf32>
    %291 = arith.divf %289, %290 : vector<8x64xf32>
    %292 = vector.extract_strided_slice %271 {offsets = [0, 128], sizes = [8, 64], strides = [1, 1]} : vector<8x192xf32> to vector<8x64xf32>
    %293 = vector.extract_strided_slice %275 {offsets = [0, 128], sizes = [8, 64], strides = [1, 1]} : vector<8x192xf32> to vector<8x64xf32>
    %294 = arith.mulf %283, %293 : vector<8x64xf32>
    %295 = arith.addf %292, %294 : vector<8x64xf32>
    %296 = math.tanh %295 : vector<8x64xf32>
    %cst_102 = arith.constant 1.000000e+00 : f32
    %297 = vector.broadcast %cst_102 : f32 to vector<8x64xf32>
    %298 = arith.subf %297, %291 : vector<8x64xf32>
    %299 = arith.mulf %298, %296 : vector<8x64xf32>
    %300 = arith.mulf %291, %265 : vector<8x64xf32>
    %301 = arith.addf %299, %300 : vector<8x64xf32>
    %302 = arith.mulf %272, %301 : vector<8x64xf32>
    %cst_103 = arith.constant 1.000000e+00 : f32
    %303 = vector.broadcast %cst_103 : f32 to vector<8x64xf32>
    %304 = arith.subf %303, %272 : vector<8x64xf32>
    %305 = arith.mulf %304, %265 : vector<8x64xf32>
    %306 = arith.addf %302, %305 : vector<8x64xf32>
    %307 = arith.mulf %272, %306 : vector<8x64xf32>
    %308 = vector.extract_strided_slice %307 {offsets = [0, 0], sizes = [8, 32], strides = [1, 1]} : vector<8x64xf32> to vector<8x32xf32>
    %c48_104 = arith.constant 48 : index
    %c0_105 = arith.constant 0 : index
    %309 = vector.load %arg11[%c48_104, %c0_105] : memref<64x64xf32, #tpu.memory_space<vmem>>, vector<8x32xf32>
    tpu.vector_store %arg11[%c48_104, %c0_105], %308 {strides = array<i32>} : memref<64x64xf32, #tpu.memory_space<vmem>>, vector<8x32xf32>,
    %310 = vector.extract_strided_slice %307 {offsets = [0, 32], sizes = [8, 32], strides = [1, 1]} : vector<8x64xf32> to vector<8x32xf32>
    %c8_106 = arith.constant 8 : index
    %c32_107 = arith.constant 32 : index
    %311 = vector.load %arg11[%c8_106, %c32_107] : memref<64x64xf32, #tpu.memory_space<vmem>>, vector<8x32xf32>
    tpu.vector_store %arg11[%c8_106, %c32_107], %310 {strides = array<i32>} : memref<64x64xf32, #tpu.memory_space<vmem>>, vector<8x32xf32>,
    %c56_108 = arith.constant 56 : index
    %c0_109 = arith.constant 0 : index
    %312 = vector.load %arg10[%c56_108, %c0_109] : memref<64x192xf32, #tpu.memory_space<vmem>>, vector<8x192xf32>
    %c56_110 = arith.constant 56 : index
    %c0_111 = arith.constant 0 : index
    %313 = vector.load %arg1[%c56_110, %c0_111] : memref<64x64xf32, #tpu.memory_space<vmem>>, vector<8x64xf32>
    %cst_112 = arith.constant dense<0.000000e+00> : vector<8x192xf32>
    %314 = tpu.matmul %306, %1, %cst_112 {dimension_numbers = #tpu.dot_dimension_numbers<[1], [0], [0], [1], [0, 0, 1, 1], [], []>} : vector<8x64xf32>, vector<64x192xf32>, vector<8x192xf32> -> vector<8x192xf32>
    %315 = vector.broadcast %4 : vector<1x192xf32> to vector<8x192xf32>
    %316 = arith.addf %314, %315 : vector<8x192xf32>
    %317 = vector.extract_strided_slice %312 {offsets = [0, 0], sizes = [8, 64], strides = [1, 1]} : vector<8x192xf32> to vector<8x64xf32>
    %318 = vector.extract_strided_slice %316 {offsets = [0, 0], sizes = [8, 64], strides = [1, 1]} : vector<8x192xf32> to vector<8x64xf32>
    %319 = arith.addf %317, %318 : vector<8x64xf32>
    %320 = arith.negf %319 : vector<8x64xf32>
    %321 = math.exp %320 : vector<8x64xf32>
    %cst_113 = arith.constant 1.000000e+00 : f32
    %322 = vector.broadcast %cst_113 : f32 to vector<8x64xf32>
    %323 = arith.addf %322, %321 : vector<8x64xf32>
    %324 = arith.divf %322, %323 : vector<8x64xf32>
    %325 = vector.extract_strided_slice %312 {offsets = [0, 64], sizes = [8, 64], strides = [1, 1]} : vector<8x192xf32> to vector<8x64xf32>
    %326 = vector.extract_strided_slice %316 {offsets = [0, 64], sizes = [8, 64], strides = [1, 1]} : vector<8x192xf32> to vector<8x64xf32>
    %327 = arith.addf %325, %326 : vector<8x64xf32>
    %328 = arith.negf %327 : vector<8x64xf32>
    %329 = math.exp %328 : vector<8x64xf32>
    %cst_114 = arith.constant 1.000000e+00 : f32
    %330 = vector.broadcast %cst_114 : f32 to vector<8x64xf32>
    %331 = arith.addf %330, %329 : vector<8x64xf32>
    %332 = arith.divf %330, %331 : vector<8x64xf32>
    %333 = vector.extract_strided_slice %312 {offsets = [0, 128], sizes = [8, 64], strides = [1, 1]} : vector<8x192xf32> to vector<8x64xf32>
    %334 = vector.extract_strided_slice %316 {offsets = [0, 128], sizes = [8, 64], strides = [1, 1]} : vector<8x192xf32> to vector<8x64xf32>
    %335 = arith.mulf %324, %334 : vector<8x64xf32>
    %336 = arith.addf %333, %335 : vector<8x64xf32>
    %337 = math.tanh %336 : vector<8x64xf32>
    %cst_115 = arith.constant 1.000000e+00 : f32
    %338 = vector.broadcast %cst_115 : f32 to vector<8x64xf32>
    %339 = arith.subf %338, %332 : vector<8x64xf32>
    %340 = arith.mulf %339, %337 : vector<8x64xf32>
    %341 = arith.mulf %332, %306 : vector<8x64xf32>
    %342 = arith.addf %340, %341 : vector<8x64xf32>
    %343 = arith.mulf %313, %342 : vector<8x64xf32>
    %cst_116 = arith.constant 1.000000e+00 : f32
    %344 = vector.broadcast %cst_116 : f32 to vector<8x64xf32>
    %345 = arith.subf %344, %313 : vector<8x64xf32>
    %346 = arith.mulf %345, %306 : vector<8x64xf32>
    %347 = arith.addf %343, %346 : vector<8x64xf32>
    %348 = arith.mulf %313, %347 : vector<8x64xf32>
    %349 = vector.extract_strided_slice %348 {offsets = [0, 0], sizes = [8, 32], strides = [1, 1]} : vector<8x64xf32> to vector<8x32xf32>
    %c56_117 = arith.constant 56 : index
    %c0_118 = arith.constant 0 : index
    %350 = vector.load %arg11[%c56_117, %c0_118] : memref<64x64xf32, #tpu.memory_space<vmem>>, vector<8x32xf32>
    tpu.vector_store %arg11[%c56_117, %c0_118], %349 {strides = array<i32>} : memref<64x64xf32, #tpu.memory_space<vmem>>, vector<8x32xf32>,
    %351 = vector.extract_strided_slice %348 {offsets = [0, 32], sizes = [8, 32], strides = [1, 1]} : vector<8x64xf32> to vector<8x32xf32>
    %c0_119 = arith.constant 0 : index
    %c32_120 = arith.constant 32 : index
    %352 = vector.load %arg11[%c0_119, %c32_120] : memref<64x64xf32, #tpu.memory_space<vmem>>, vector<8x32xf32>
    tpu.vector_store %arg11[%c0_119, %c32_120], %351 {strides = array<i32>} : memref<64x64xf32, #tpu.memory_space<vmem>>, vector<8x32xf32>,
    %cst_121 = arith.constant dense<0.000000e+00> : vector<8x32xf32>
    %353 = tpu.matmul %347, %5, %cst_121 {dimension_numbers = #tpu.dot_dimension_numbers<[1], [0], [0], [1], [0, 0, 1, 1], [], []>} : vector<8x64xf32>, vector<64x32xf32>, vector<8x32xf32> -> vector<8x32xf32>
    %354 = vector.broadcast %9 : vector<1x32xf32> to vector<8x32xf32>
    %355 = arith.addf %353, %354 : vector<8x32xf32>
    %356 = math.tanh %355 : vector<8x32xf32>
    %c0_122 = arith.constant 0 : index
    %c0_123 = arith.constant 0 : index
    %357 = vector.load %arg11[%c0_122, %c0_123] : memref<64x64xf32, #tpu.memory_space<vmem>>, vector<64x64xf32>
    %cst_124 = arith.constant dense<0.000000e+00> : vector<64x32xf32>
    %358 = tpu.matmul %357, %6, %cst_124 {dimension_numbers = #tpu.dot_dimension_numbers<[1], [0], [0], [1], [0, 0, 1, 1], [], []>} : vector<64x64xf32>, vector<64x32xf32>, vector<64x32xf32> -> vector<64x32xf32>
    %cst_125 = arith.constant dense<0.000000e+00> : vector<8x32xf32>
    %359 = tpu.matmul %356, %7, %cst_125 {dimension_numbers = #tpu.dot_dimension_numbers<[1], [0], [0], [1], [0, 0, 1, 1], [], []>} : vector<8x32xf32>, vector<32x32xf32>, vector<8x32xf32> -> vector<8x32xf32>
    %360 = vector.broadcast %10 : vector<1x32xf32> to vector<8x32xf32>
    %361 = arith.addf %359, %360 : vector<8x32xf32>
    %362 = vector.extract_strided_slice %358 {offsets = [0, 0], sizes = [8, 32], strides = [1, 1]} : vector<64x32xf32> to vector<8x32xf32>
    %363 = arith.addf %362, %361 : vector<8x32xf32>
    %364 = math.tanh %363 : vector<8x32xf32>
    %365 = vector.broadcast %11 : vector<1x32xf32> to vector<8x32xf32>
    %366 = arith.mulf %364, %365 : vector<8x32xf32>
    %cst_126 = arith.constant dense<0.000000e+00> : vector<8xf32>
    %367 = vector.multi_reduction <add>, %366, %cst_126 [1] : vector<8x32xf32> to vector<8xf32>
    %368 = vector.shape_cast %367 : vector<8xf32> to vector<8x1xf32>
    %c0_127 = arith.constant 0 : index
    %c0_128 = arith.constant 0 : index
    %369 = vector.load %arg1[%c0_127, %c0_128] : memref<64x64xf32, #tpu.memory_space<vmem>>, vector<8x1xf32>
    %cst_129 = arith.constant 5.000000e-01 : f32
    %370 = vector.broadcast %cst_129 : f32 to vector<8x1xf32>
    %371 = arith.cmpf ogt, %369, %370 : vector<8x1xf32>
    %cst_130 = arith.constant -1.000000e+10 : f32
    %372 = vector.broadcast %cst_130 : f32 to vector<8x1xf32>
    %373 = arith.select %371, %368, %372 : vector<8x1xi1>, vector<8x1xf32>
    %374 = vector.extract_strided_slice %358 {offsets = [8, 0], sizes = [8, 32], strides = [1, 1]} : vector<64x32xf32> to vector<8x32xf32>
    %375 = arith.addf %374, %361 : vector<8x32xf32>
    %376 = math.tanh %375 : vector<8x32xf32>
    %377 = vector.broadcast %11 : vector<1x32xf32> to vector<8x32xf32>
    %378 = arith.mulf %376, %377 : vector<8x32xf32>
    %cst_131 = arith.constant dense<0.000000e+00> : vector<8xf32>
    %379 = vector.multi_reduction <add>, %378, %cst_131 [1] : vector<8x32xf32> to vector<8xf32>
    %380 = vector.shape_cast %379 : vector<8xf32> to vector<8x1xf32>
    %c8_132 = arith.constant 8 : index
    %c0_133 = arith.constant 0 : index
    %381 = vector.load %arg1[%c8_132, %c0_133] : memref<64x64xf32, #tpu.memory_space<vmem>>, vector<8x1xf32>
    %cst_134 = arith.constant 5.000000e-01 : f32
    %382 = vector.broadcast %cst_134 : f32 to vector<8x1xf32>
    %383 = arith.cmpf ogt, %381, %382 : vector<8x1xf32>
    %cst_135 = arith.constant -1.000000e+10 : f32
    %384 = vector.broadcast %cst_135 : f32 to vector<8x1xf32>
    %385 = arith.select %383, %380, %384 : vector<8x1xi1>, vector<8x1xf32>
    %386 = vector.extract_strided_slice %358 {offsets = [16, 0], sizes = [8, 32], strides = [1, 1]} : vector<64x32xf32> to vector<8x32xf32>
    %387 = arith.addf %386, %361 : vector<8x32xf32>
    %388 = math.tanh %387 : vector<8x32xf32>
    %389 = vector.broadcast %11 : vector<1x32xf32> to vector<8x32xf32>
    %390 = arith.mulf %388, %389 : vector<8x32xf32>
    %cst_136 = arith.constant dense<0.000000e+00> : vector<8xf32>
    %391 = vector.multi_reduction <add>, %390, %cst_136 [1] : vector<8x32xf32> to vector<8xf32>
    %392 = vector.shape_cast %391 : vector<8xf32> to vector<8x1xf32>
    %c16_137 = arith.constant 16 : index
    %c0_138 = arith.constant 0 : index
    %393 = vector.load %arg1[%c16_137, %c0_138] : memref<64x64xf32, #tpu.memory_space<vmem>>, vector<8x1xf32>
    %cst_139 = arith.constant 5.000000e-01 : f32
    %394 = vector.broadcast %cst_139 : f32 to vector<8x1xf32>
    %395 = arith.cmpf ogt, %393, %394 : vector<8x1xf32>
    %cst_140 = arith.constant -1.000000e+10 : f32
    %396 = vector.broadcast %cst_140 : f32 to vector<8x1xf32>
    %397 = arith.select %395, %392, %396 : vector<8x1xi1>, vector<8x1xf32>
    %398 = vector.extract_strided_slice %358 {offsets = [24, 0], sizes = [8, 32], strides = [1, 1]} : vector<64x32xf32> to vector<8x32xf32>
    %399 = arith.addf %398, %361 : vector<8x32xf32>
    %400 = math.tanh %399 : vector<8x32xf32>
    %401 = vector.broadcast %11 : vector<1x32xf32> to vector<8x32xf32>
    %402 = arith.mulf %400, %401 : vector<8x32xf32>
    %cst_141 = arith.constant dense<0.000000e+00> : vector<8xf32>
    %403 = vector.multi_reduction <add>, %402, %cst_141 [1] : vector<8x32xf32> to vector<8xf32>
    %404 = vector.shape_cast %403 : vector<8xf32> to vector<8x1xf32>
    %c24_142 = arith.constant 24 : index
    %c0_143 = arith.constant 0 : index
    %405 = vector.load %arg1[%c24_142, %c0_143] : memref<64x64xf32, #tpu.memory_space<vmem>>, vector<8x1xf32>
    %cst_144 = arith.constant 5.000000e-01 : f32
    %406 = vector.broadcast %cst_144 : f32 to vector<8x1xf32>
    %407 = arith.cmpf ogt, %405, %406 : vector<8x1xf32>
    %cst_145 = arith.constant -1.000000e+10 : f32
    %408 = vector.broadcast %cst_145 : f32 to vector<8x1xf32>
    %409 = arith.select %407, %404, %408 : vector<8x1xi1>, vector<8x1xf32>
    %410 = vector.extract_strided_slice %358 {offsets = [32, 0], sizes = [8, 32], strides = [1, 1]} : vector<64x32xf32> to vector<8x32xf32>
    %411 = arith.addf %410, %361 : vector<8x32xf32>
    %412 = math.tanh %411 : vector<8x32xf32>
    %413 = vector.broadcast %11 : vector<1x32xf32> to vector<8x32xf32>
    %414 = arith.mulf %412, %413 : vector<8x32xf32>
    %cst_146 = arith.constant dense<0.000000e+00> : vector<8xf32>
    %415 = vector.multi_reduction <add>, %414, %cst_146 [1] : vector<8x32xf32> to vector<8xf32>
    %416 = vector.shape_cast %415 : vector<8xf32> to vector<8x1xf32>
    %c32_147 = arith.constant 32 : index
    %c0_148 = arith.constant 0 : index
    %417 = vector.load %arg1[%c32_147, %c0_148] : memref<64x64xf32, #tpu.memory_space<vmem>>, vector<8x1xf32>
    %cst_149 = arith.constant 5.000000e-01 : f32
    %418 = vector.broadcast %cst_149 : f32 to vector<8x1xf32>
    %419 = arith.cmpf ogt, %417, %418 : vector<8x1xf32>
    %cst_150 = arith.constant -1.000000e+10 : f32
    %420 = vector.broadcast %cst_150 : f32 to vector<8x1xf32>
    %421 = arith.select %419, %416, %420 : vector<8x1xi1>, vector<8x1xf32>
    %422 = vector.extract_strided_slice %358 {offsets = [40, 0], sizes = [8, 32], strides = [1, 1]} : vector<64x32xf32> to vector<8x32xf32>
    %423 = arith.addf %422, %361 : vector<8x32xf32>
    %424 = math.tanh %423 : vector<8x32xf32>
    %425 = vector.broadcast %11 : vector<1x32xf32> to vector<8x32xf32>
    %426 = arith.mulf %424, %425 : vector<8x32xf32>
    %cst_151 = arith.constant dense<0.000000e+00> : vector<8xf32>
    %427 = vector.multi_reduction <add>, %426, %cst_151 [1] : vector<8x32xf32> to vector<8xf32>
    %428 = vector.shape_cast %427 : vector<8xf32> to vector<8x1xf32>
    %c40_152 = arith.constant 40 : index
    %c0_153 = arith.constant 0 : index
    %429 = vector.load %arg1[%c40_152, %c0_153] : memref<64x64xf32, #tpu.memory_space<vmem>>, vector<8x1xf32>
    %cst_154 = arith.constant 5.000000e-01 : f32
    %430 = vector.broadcast %cst_154 : f32 to vector<8x1xf32>
    %431 = arith.cmpf ogt, %429, %430 : vector<8x1xf32>
    %cst_155 = arith.constant -1.000000e+10 : f32
    %432 = vector.broadcast %cst_155 : f32 to vector<8x1xf32>
    %433 = arith.select %431, %428, %432 : vector<8x1xi1>, vector<8x1xf32>
    %434 = vector.extract_strided_slice %358 {offsets = [48, 0], sizes = [8, 32], strides = [1, 1]} : vector<64x32xf32> to vector<8x32xf32>
    %435 = arith.addf %434, %361 : vector<8x32xf32>
    %436 = math.tanh %435 : vector<8x32xf32>
    %437 = vector.broadcast %11 : vector<1x32xf32> to vector<8x32xf32>
    %438 = arith.mulf %436, %437 : vector<8x32xf32>
    %cst_156 = arith.constant dense<0.000000e+00> : vector<8xf32>
    %439 = vector.multi_reduction <add>, %438, %cst_156 [1] : vector<8x32xf32> to vector<8xf32>
    %440 = vector.shape_cast %439 : vector<8xf32> to vector<8x1xf32>
    %c48_157 = arith.constant 48 : index
    %c0_158 = arith.constant 0 : index
    %441 = vector.load %arg1[%c48_157, %c0_158] : memref<64x64xf32, #tpu.memory_space<vmem>>, vector<8x1xf32>
    %cst_159 = arith.constant 5.000000e-01 : f32
    %442 = vector.broadcast %cst_159 : f32 to vector<8x1xf32>
    %443 = arith.cmpf ogt, %441, %442 : vector<8x1xf32>
    %cst_160 = arith.constant -1.000000e+10 : f32
    %444 = vector.broadcast %cst_160 : f32 to vector<8x1xf32>
    %445 = arith.select %443, %440, %444 : vector<8x1xi1>, vector<8x1xf32>
    %446 = vector.extract_strided_slice %358 {offsets = [56, 0], sizes = [8, 32], strides = [1, 1]} : vector<64x32xf32> to vector<8x32xf32>
    %447 = arith.addf %446, %361 : vector<8x32xf32>
    %448 = math.tanh %447 : vector<8x32xf32>
    %449 = vector.broadcast %11 : vector<1x32xf32> to vector<8x32xf32>
    %450 = arith.mulf %448, %449 : vector<8x32xf32>
    %cst_161 = arith.constant dense<0.000000e+00> : vector<8xf32>
    %451 = vector.multi_reduction <add>, %450, %cst_161 [1] : vector<8x32xf32> to vector<8xf32>
    %452 = vector.shape_cast %451 : vector<8xf32> to vector<8x1xf32>
    %c56_162 = arith.constant 56 : index
    %c0_163 = arith.constant 0 : index
    %453 = vector.load %arg1[%c56_162, %c0_163] : memref<64x64xf32, #tpu.memory_space<vmem>>, vector<8x1xf32>
    %cst_164 = arith.constant 5.000000e-01 : f32
    %454 = vector.broadcast %cst_164 : f32 to vector<8x1xf32>
    %455 = arith.cmpf ogt, %453, %454 : vector<8x1xf32>
    %cst_165 = arith.constant -1.000000e+10 : f32
    %456 = vector.broadcast %cst_165 : f32 to vector<8x1xf32>
    %457 = arith.select %455, %452, %456 : vector<8x1xi1>, vector<8x1xf32>
    %458 = tpu.concatenate %373, %385, %397, %409, %421, %433, %445, %457 in 1 : vector<8x1xf32>, vector<8x1xf32>, vector<8x1xf32>, vector<8x1xf32>, vector<8x1xf32>, vector<8x1xf32>, vector<8x1xf32>, vector<8x1xf32> -> vector<8x8xf32>
    %cst_166 = arith.constant dense<0xFF800000> : vector<8xf32>
    %459 = vector.multi_reduction <maximumf>, %458, %cst_166 [1] : vector<8x8xf32> to vector<8xf32>
    %460 = vector.shape_cast %459 : vector<8xf32> to vector<8x1xf32>
    %461 = vector.broadcast %460 : vector<8x1xf32> to vector<8x8xf32>
    %462 = arith.subf %458, %461 : vector<8x8xf32>
    %463 = math.exp %462 : vector<8x8xf32>
    %cst_167 = arith.constant dense<0.000000e+00> : vector<8xf32>
    %464 = vector.multi_reduction <add>, %463, %cst_167 [1] : vector<8x8xf32> to vector<8xf32>
    %465 = vector.shape_cast %464 : vector<8xf32> to vector<8x1xf32>
    %466 = vector.broadcast %465 : vector<8x1xf32> to vector<8x8xf32>
    %467 = arith.divf %463, %466 : vector<8x8xf32>
    %c0_168 = arith.constant 0 : index
    %c0_169 = arith.constant 0 : index
    %468 = vector.load %arg9[%c0_168, %c0_169] : memref<8x8xf32, #tpu.memory_space<vmem>>, vector<8x8xf32>
    tpu.vector_store %arg9[%c0_168, %c0_169], %467 {strides = array<i32>} : memref<8x8xf32, #tpu.memory_space<vmem>>, vector<8x8xf32>,
    %cst_170 = arith.constant 0.000000e+00 : f32
    %469 = vector.broadcast %cst_170 : f32 to vector<8x64xf32>
    %470 = vector.extract_strided_slice %467 {offsets = [0, 0], sizes = [8, 1], strides = [1, 1]} : vector<8x8xf32> to vector<8x1xf32>
    %c0_171 = arith.constant 0 : index
    %c0_172 = arith.constant 0 : index
    %471 = vector.load %arg11[%c0_171, %c0_172] : memref<64x64xf32, #tpu.memory_space<vmem>>, vector<8x64xf32>
    %472 = vector.broadcast %470 : vector<8x1xf32> to vector<8x64xf32>
    %473 = arith.mulf %472, %471 : vector<8x64xf32>
    %474 = arith.addf %469, %473 : vector<8x64xf32>
    %475 = vector.extract_strided_slice %467 {offsets = [0, 1], sizes = [8, 1], strides = [1, 1]} : vector<8x8xf32> to vector<8x1xf32>
    %c8_173 = arith.constant 8 : index
    %c0_174 = arith.constant 0 : index
    %476 = vector.load %arg11[%c8_173, %c0_174] : memref<64x64xf32, #tpu.memory_space<vmem>>, vector<8x64xf32>
    %477 = vector.broadcast %475 : vector<8x1xf32> to vector<8x64xf32>
    %478 = arith.mulf %477, %476 : vector<8x64xf32>
    %479 = arith.addf %474, %478 : vector<8x64xf32>
    %480 = vector.extract_strided_slice %467 {offsets = [0, 2], sizes = [8, 1], strides = [1, 1]} : vector<8x8xf32> to vector<8x1xf32>
    %c16_175 = arith.constant 16 : index
    %c0_176 = arith.constant 0 : index
    %481 = vector.load %arg11[%c16_175, %c0_176] : memref<64x64xf32, #tpu.memory_space<vmem>>, vector<8x64xf32>
    %482 = vector.broadcast %480 : vector<8x1xf32> to vector<8x64xf32>
    %483 = arith.mulf %482, %481 : vector<8x64xf32>
    %484 = arith.addf %479, %483 : vector<8x64xf32>
    %485 = vector.extract_strided_slice %467 {offsets = [0, 3], sizes = [8, 1], strides = [1, 1]} : vector<8x8xf32> to vector<8x1xf32>
    %c24_177 = arith.constant 24 : index
    %c0_178 = arith.constant 0 : index
    %486 = vector.load %arg11[%c24_177, %c0_178] : memref<64x64xf32, #tpu.memory_space<vmem>>, vector<8x64xf32>
    %487 = vector.broadcast %485 : vector<8x1xf32> to vector<8x64xf32>
    %488 = arith.mulf %487, %486 : vector<8x64xf32>
    %489 = arith.addf %484, %488 : vector<8x64xf32>
    %490 = vector.extract_strided_slice %467 {offsets = [0, 4], sizes = [8, 1], strides = [1, 1]} : vector<8x8xf32> to vector<8x1xf32>
    %c32_179 = arith.constant 32 : index
    %c0_180 = arith.constant 0 : index
    %491 = vector.load %arg11[%c32_179, %c0_180] : memref<64x64xf32, #tpu.memory_space<vmem>>, vector<8x64xf32>
    %492 = vector.broadcast %490 : vector<8x1xf32> to vector<8x64xf32>
    %493 = arith.mulf %492, %491 : vector<8x64xf32>
    %494 = arith.addf %489, %493 : vector<8x64xf32>
    %495 = vector.extract_strided_slice %467 {offsets = [0, 5], sizes = [8, 1], strides = [1, 1]} : vector<8x8xf32> to vector<8x1xf32>
    %c40_181 = arith.constant 40 : index
    %c0_182 = arith.constant 0 : index
    %496 = vector.load %arg11[%c40_181, %c0_182] : memref<64x64xf32, #tpu.memory_space<vmem>>, vector<8x64xf32>
    %497 = vector.broadcast %495 : vector<8x1xf32> to vector<8x64xf32>
    %498 = arith.mulf %497, %496 : vector<8x64xf32>
    %499 = arith.addf %494, %498 : vector<8x64xf32>
    %500 = vector.extract_strided_slice %467 {offsets = [0, 6], sizes = [8, 1], strides = [1, 1]} : vector<8x8xf32> to vector<8x1xf32>
    %c48_183 = arith.constant 48 : index
    %c0_184 = arith.constant 0 : index
    %501 = vector.load %arg11[%c48_183, %c0_184] : memref<64x64xf32, #tpu.memory_space<vmem>>, vector<8x64xf32>
    %502 = vector.broadcast %500 : vector<8x1xf32> to vector<8x64xf32>
    %503 = arith.mulf %502, %501 : vector<8x64xf32>
    %504 = arith.addf %499, %503 : vector<8x64xf32>
    %505 = vector.extract_strided_slice %467 {offsets = [0, 7], sizes = [8, 1], strides = [1, 1]} : vector<8x8xf32> to vector<8x1xf32>
    %c56_185 = arith.constant 56 : index
    %c0_186 = arith.constant 0 : index
    %506 = vector.load %arg11[%c56_185, %c0_186] : memref<64x64xf32, #tpu.memory_space<vmem>>, vector<8x64xf32>
    %507 = vector.broadcast %505 : vector<8x1xf32> to vector<8x64xf32>
    %508 = arith.mulf %507, %506 : vector<8x64xf32>
    %509 = arith.addf %504, %508 : vector<8x64xf32>
    %c0_187 = arith.constant 0 : index
    %c0_188 = arith.constant 0 : index
    %510 = vector.load %arg2[%c0_187, %c0_188] : memref<8x32xf32, #tpu.memory_space<vmem>>, vector<8x32xf32>
    %511 = tpu.concatenate %510, %509 in 1 : vector<8x32xf32>, vector<8x64xf32> -> vector<8x96xf32>
    %cst_189 = arith.constant dense<0.000000e+00> : vector<8x96xf32>
    %512 = tpu.matmul %511, %12, %cst_189 {dimension_numbers = #tpu.dot_dimension_numbers<[1], [0], [0], [1], [0, 0, 1, 1], [], []>} : vector<8x96xf32>, vector<96x96xf32>, vector<8x96xf32> -> vector<8x96xf32>
    %513 = vector.broadcast %15 : vector<1x96xf32> to vector<8x96xf32>
    %514 = arith.addf %512, %513 : vector<8x96xf32>
    %cst_190 = arith.constant dense<0.000000e+00> : vector<8x96xf32>
    %515 = tpu.matmul %356, %13, %cst_190 {dimension_numbers = #tpu.dot_dimension_numbers<[1], [0], [0], [1], [0, 0, 1, 1], [], []>} : vector<8x32xf32>, vector<32x96xf32>, vector<8x96xf32> -> vector<8x96xf32>
    %516 = vector.broadcast %16 : vector<1x96xf32> to vector<8x96xf32>
    %517 = arith.addf %515, %516 : vector<8x96xf32>
    %518 = vector.extract_strided_slice %514 {offsets = [0, 0], sizes = [8, 32], strides = [1, 1]} : vector<8x96xf32> to vector<8x32xf32>
    %519 = vector.extract_strided_slice %517 {offsets = [0, 0], sizes = [8, 32], strides = [1, 1]} : vector<8x96xf32> to vector<8x32xf32>
    %520 = arith.addf %518, %519 : vector<8x32xf32>
    %521 = arith.negf %520 : vector<8x32xf32>
    %522 = math.exp %521 : vector<8x32xf32>
    %cst_191 = arith.constant 1.000000e+00 : f32
    %523 = vector.broadcast %cst_191 : f32 to vector<8x32xf32>
    %524 = arith.addf %523, %522 : vector<8x32xf32>
    %525 = arith.divf %523, %524 : vector<8x32xf32>
    %526 = vector.extract_strided_slice %514 {offsets = [0, 32], sizes = [8, 32], strides = [1, 1]} : vector<8x96xf32> to vector<8x32xf32>
    %527 = vector.extract_strided_slice %517 {offsets = [0, 32], sizes = [8, 32], strides = [1, 1]} : vector<8x96xf32> to vector<8x32xf32>
    %528 = arith.addf %526, %527 : vector<8x32xf32>
    %529 = arith.negf %528 : vector<8x32xf32>
    %530 = math.exp %529 : vector<8x32xf32>
    %cst_192 = arith.constant 1.000000e+00 : f32
    %531 = vector.broadcast %cst_192 : f32 to vector<8x32xf32>
    %532 = arith.addf %531, %530 : vector<8x32xf32>
    %533 = arith.divf %531, %532 : vector<8x32xf32>
    %534 = vector.extract_strided_slice %514 {offsets = [0, 64], sizes = [8, 32], strides = [1, 1]} : vector<8x96xf32> to vector<8x32xf32>
    %535 = vector.extract_strided_slice %517 {offsets = [0, 64], sizes = [8, 32], strides = [1, 1]} : vector<8x96xf32> to vector<8x32xf32>
    %536 = arith.mulf %525, %535 : vector<8x32xf32>
    %537 = arith.addf %534, %536 : vector<8x32xf32>
    %538 = math.tanh %537 : vector<8x32xf32>
    %cst_193 = arith.constant 1.000000e+00 : f32
    %539 = vector.broadcast %cst_193 : f32 to vector<8x32xf32>
    %540 = arith.subf %539, %533 : vector<8x32xf32>
    %541 = arith.mulf %540, %538 : vector<8x32xf32>
    %542 = arith.mulf %533, %356 : vector<8x32xf32>
    %543 = arith.addf %541, %542 : vector<8x32xf32>
    %544 = tpu.concatenate %510, %509, %543 in 1 : vector<8x32xf32>, vector<8x64xf32>, vector<8x32xf32> -> vector<8x128xf32>
    %cst_194 = arith.constant dense<0.000000e+00> : vector<8x128xf32>
    %545 = tpu.matmul %544, %17, %cst_194 {dimension_numbers = #tpu.dot_dimension_numbers<[1], [0], [0], [1], [0, 0, 1, 1], [], []>} : vector<8x128xf32>, vector<128x128xf32>, vector<8x128xf32> -> vector<8x128xf32>
    %546 = vector.broadcast %18 : vector<1x128xf32> to vector<8x128xf32>
    %547 = arith.addf %545, %546 : vector<8x128xf32>
    %c0_195 = arith.constant 0 : index
    %c0_196 = arith.constant 0 : index
    %548 = vector.load %arg7[%c0_195, %c0_196] : memref<8x128xf32, #tpu.memory_space<vmem>>, vector<8x128xf32>
    tpu.vector_store %arg7[%c0_195, %c0_196], %547 {strides = array<i32>} : memref<8x128xf32, #tpu.memory_space<vmem>>, vector<8x128xf32>,
    %c0_197 = arith.constant 0 : index
    %c0_198 = arith.constant 0 : index
    %549 = vector.load %arg8[%c0_197, %c0_198] : memref<8x32xf32, #tpu.memory_space<vmem>>, vector<8x32xf32>
    tpu.vector_store %arg8[%c0_197, %c0_198], %543 {strides = array<i32>} : memref<8x32xf32, #tpu.memory_space<vmem>>, vector<8x32xf32>,
    return
  }
}

</mosaic_0001>

<bundles_post_ra>
// kernel: seq2seq_forward.1
= control target key start
LH: loop header
LB: loop body
LE: loop exit
PB: predicated region body
PF: predicated region fallthrough
CT: control target
= control target key end

     0   :  { %v2503_v3 = vmov 0.0   ;;  %vm134_vm0 = vcmask 523264   ;;  %v126_v54 = vlaneseq  ;;  %s2504_s25 = smov 64   ;;  %vm400_vm1 = vcmask 261120   ;;  %s2507_s29 = smov 1   ;;  %s3295_s3 = inlined_call_operand.vmem [shape: f32[130,192], index: 3, kind: input, shape index: {}]   ;;  %s3296_s0 = inlined_call_operand.vmem [shape: f32[64,64], index: 0, kind: input, shape index: {}]   ;;  %s3297_s1 = inlined_call_operand.vmem [shape: f32[64,64], index: 1, kind: input, shape index: {}]   ;;  %s3298_s4 = inlined_call_operand.vmem [shape: f32[163,32], index: 4, kind: input, shape index: {}]   ;;  %s3299_s5 = inlined_call_operand.vmem [shape: f32[130,96], index: 5, kind: input, shape index: {}]   ;;  %s3300_s9 = inlined_call_operand.vmem [shape: f32[8,8], index: 9, kind: output, shape index: {2}]   ;;  %s3301_s2 = inlined_call_operand.vmem [shape: f32[8,32], index: 2, kind: input, shape index: {}]   ;;  %s3302_s6 = inlined_call_operand.vmem [shape: f32[129,128], index: 6, kind: input, shape index: {}]   ;;  %s3303_s8 = inlined_call_operand.vmem [shape: f32[8,32], index: 8, kind: output, shape index: {1}]   ;;  %s3304_s7 = inlined_call_operand.vmem [shape: f32[8,128], index: 7, kind: output, shape index: {0}]  }
   0x1   :  { %v30_v0 = vld [vmem:[%s3295_s3 + $0x8] sm:$0xff]  ;;  %v32_v1 = vld [vmem:[%s3295_s3 + $0x18] sm:$0xff]  ;;  %v29_v2 = vld [vmem:[%s3295_s3] sm:$0xff]  ;;  %247 = vmatprep.mubr.f32.mxu1 %v2503_v3  ;;  %223 = vmatprep.mubr.f32.mxu0 %v2503_v3  ;;  %vm402_vm2 = vcmask 523520   ;;  %vm2506_vm3 = vmmov 0   ;;  %s2508_s30 = smov 2  }
   0x2   :  { %v2163_v4 = vpack.c.bf16 %v32_v1, %v30_v0  ;;  %v31_v5 = vld [vmem:[%s3295_s3 + $0x10] sm:$0xff]  ;;  %v34_v6 = vld [vmem:[%s3295_s3 + $0x28] sm:$0xff]  ;;  %v36_v7 = vld [vmem:[%s3295_s3 + $0x38] sm:$0xff]  ;;  %v2741_v55 = vshrl.u32 %v126_v54, 7  ;;  %s2509_s10 = smov 4   ;;  %s2510_s11 = smov 3  }
   0x3   :  { %v2165_v8 = vpack.c.bf16 %v31_v5, %v29_v2  ;;  %v2167_v9 = vpack.c.bf16 %v36_v7, %v34_v6  ;;  %v33_v10 = vld [vmem:[%s3295_s3 + $0x20] sm:$0xff]  ;;  %v35_v11 = vld [vmem:[%s3295_s3 + $0x30] sm:$0xff]  ;;  %v38_v12 = vld [vmem:[%s3295_s3 + $0x48] sm:$0xff]  ;;  %s2512_s12 = smov 5   ;;  %s2513_s13 = smov 7   ;;  %vm1563_vm12 = vcmask 7168  }
   0x4   :  { %2389 = vmatprep.subr.bf16.mxu1 %v2163_v4  ;;  %2164 = vmatprep.subr.bf16.mxu0 %v2163_v4  ;;  %v40_v13 = vld [vmem:[%s3295_s3 + $0x58] sm:$0xff]  ;;  %v2169_v14 = vpack.c.bf16 %v35_v11, %v33_v10  ;;  %v37_v16 = vld [vmem:[%s3295_s3 + $0x40] sm:$0xff]  ;;  %v39_v17 = vld [vmem:[%s3295_s3 + $0x50] sm:$0xff]  ;;  %v2744_v56 = vsub.s32 0, %v2741_v55  ;;  %vm1565_vm13 = vcmask 15360   ;;  %vm1567_vm14 = vcmask 23552  }
   0x5   :  { %2393 = vmatpush1.bf16.msra.mxu1 %v2165_v8  ;;  %2166 = vmatpush1.bf16.msra.mxu0 %v2165_v8  ;;  %v2171_v15 = vpack.c.bf16 %v40_v13, %v38_v12  ;;  %v42_v18 = vld [vmem:[%s3295_s3 + $0x68] sm:$0xff]  ;;  %v44_v19 = vld [vmem:[%s3295_s3 + $0x78] sm:$0xff]  ;;  %v2173_v20 = vpack.c.bf16 %v39_v17, %v37_v16  ;;  %v41_v22 = vld [vmem:[%s3295_s3 + $0x60] sm:$0xff]  ;;  %v2775_v13 = vsub.s32 1, %v2741_v55  ;;  %vm1569_vm15 = vcmask 31744  }
   0x6   :  { %2390 = vmatprep.subr.bf16.mxu1 %v2167_v9  ;;  %2168 = vmatprep.subr.bf16.mxu0 %v2167_v9  ;;  %v2175_v21 = vpack.c.bf16 %v44_v19, %v42_v18  ;;  %v43_v23 = vld [vmem:[%s3295_s3 + $0x70] sm:$0xff]  ;;  %v46_v24 = vld [vmem:[%s3295_s3 + $0x88] sm:$0xff]  ;;  %v48_v25 = vld [vmem:[%s3295_s3 + $0x98] sm:$0xff] }
   0x7   :  { %v2177_v26 = vpack.c.bf16 %v43_v23, %v41_v22  ;;  %v2630_v27 = vpack.c.bf16 %v48_v25, %v46_v24  ;;  %v45_v28 = vld [vmem:[%s3295_s3 + $0x80] sm:$0xff]  ;;  %v47_v29 = vld [vmem:[%s3295_s3 + $0x90] sm:$0xff]  ;;  %v50_v30 = vld [vmem:[%s3295_s3 + $0xa8] sm:$0xff] }
   0x8   :  { %v52_v31 = vld [vmem:[%s3295_s3 + $0xb8] sm:$0xff]  ;;  %v122_v32 = vld [vmem:[%s3296_s0 + $0x20] sm:$0xff]  ;;  %v2647_v33 = vpack.c.bf16 %v47_v29, %v45_v28  ;;  %v51_v37 = vld [vmem:[%s3295_s3 + $0xb0] sm:$0xff] }
   0x9   :  { %2394 = vmatpush1.bf16.msra.mxu1 %v2169_v14  ;;  %2170 = vmatpush1.bf16.msra.mxu0 %v2169_v14  ;;  %v118_v34 = vld [vmem:[%s3296_s0] sm:$0xff]  ;;  %v2653_v35 = vpack.c.bf16 %v52_v31, %v50_v30  ;;  %v54_v38 = vld [vmem:[%s3295_s3 + $0xc8] sm:$0xff]  ;;  %v56_v39 = vld [vmem:[%s3295_s3 + $0xd8] sm:$0xff] }
   0xa   :  { %2391 = vmatprep.subr.bf16.mxu1 %v2171_v15  ;;  %2172 = vmatprep.subr.bf16.mxu0 %v2171_v15  ;;  %v49_v36 = vld [vmem:[%s3295_s3 + $0xa0] sm:$0xff]  ;;  %v123_v40 = vld [vmem:[%s3296_s0 + $0x28] sm:$0xff]  ;;  %v2678_v42 = vpack.c.bf16 %v56_v39, %v54_v38  ;;  %v55_v44 = vld [vmem:[%s3295_s3 + $0xd0] sm:$0xff] }
   0xb   :  { %v2675_v41 = vpack.c.bf16 %v51_v37, %v49_v36  ;;  %v53_v43 = vld [vmem:[%s3295_s3 + $0xc0] sm:$0xff]  ;;  %v58_v45 = vld [vmem:[%s3295_s3 + $0xe8] sm:$0xff]  ;;  %v60_v46 = vld [vmem:[%s3295_s3 + $0xf8] sm:$0xff] }
   0xc   :  { %v124_v47 = vld [vmem:[%s3296_s0 + $0x30] sm:$0xff]  ;;  %v2701_v48 = vpack.c.bf16 %v55_v44, %v53_v43  ;;  %v2704_v49 = vpack.c.bf16 %v60_v46, %v58_v45  ;;  %v57_v50 = vld [vmem:[%s3295_s3 + $0xe0] sm:$0xff]  ;;  %v125_v52 = vld [vmem:[%s3296_s0 + $0x38] sm:$0xff] }
   0xd   :  { %2395 = vmatpush1.bf16.msra.mxu1 %v2173_v20  ;;  %2174 = vmatpush1.bf16.msra.mxu0 %v2173_v20  ;;  %v59_v51 = vld [vmem:[%s3295_s3 + $0xf0] sm:$0xff]  ;;  %v61_v57 = vld [vmem:[%s3295_s3 + $0x100] sm:$0x3]  ;;  %v62_v58 = vld [vmem:[%s3295_s3 + $0x108] sm:$0x3] }
   0xe   :  { %2392 = vmatprep.subr.bf16.mxu1 %v2175_v21  ;;  %2176 = vmatprep.subr.bf16.mxu0 %v2175_v21  ;;  %v2720_v53 = vpack.c.bf16 %v59_v51, %v57_v50  ;;  %v2753_v59 = vrot.slane %v61_v57, %v2744_v56  ;;  %v2756_v60 = vrot.slane %v62_v58, %v2744_v56  ;;  %v119_v36 = vld [vmem:[%s3296_s0 + $0x8] sm:$0xff]  ;;  %v290_v51 = vld [vmem:[%s3297_s1] sm:$0xff] }
   0xf   :  { %v2783_v18 = vrot.slane %v61_v57, %v2775_v13  ;;  %v2789_v28 = vrot.slane %v62_v58, %v2775_v13 }
  0x11   :  { %2396 = vmatpush1.bf16.msra.mxu1 %v2177_v26  ;;  %2178 = vmatpush1.bf16.msra.mxu0 %v2177_v26 }
  0x12   :  { %2180 = vmatprep.subr.bf16.mxu1 %v2630_v27  ;;  %2212 = vmatprep.subr.bf16.mxu0 %v2630_v27 }
  0x14   :  { %1934 = vmatmul.mubr.msk.f32.vlgmr.msra.gmra.mrb[0].mxu1 %vm134_vm0, %v122_v32  ;;  %1930 = vmatmul.mubr.msk.f32.vlgmr.msra.gmra.mrb[0].mxu0 %vm134_vm0, %v118_v34 }
  0x15   :  { %2182 = vmatpush1.bf16.msra.mxu1 %v2647_v33  ;;  %253 = vmatprep.mubr.f32.mxu1 %v2503_v3 }
  0x16   :  { %2184 = vmatprep.subr.bf16.mxu1 %v2653_v35  ;;  %229 = vmatprep.mubr.f32.mxu0 %v2503_v3 }
  0x17   :  { %2214 = vmatpush1.bf16.msra.mxu0 %v2647_v33 }
  0x18   :  { %1935 = vmatmul.mubr.msk.f32.gmra.mrb[2].mxu1 %vm134_vm0, %v123_v40  ;;  %2216 = vmatprep.subr.bf16.mxu0 %v2653_v35 }
  0x19   :  { %2186 = vmatpush1.bf16.msra.mxu1 %v2675_v41  ;;  %259 = vmatprep.mubr.f32.mxu1 %v2503_v3 }
  0x1a   :  { %2188 = vmatprep.subr.bf16.mxu1 %v2678_v42  ;;  %1931 = vmatmul.mubr.msk.f32.gmra.mrb[2].mxu0 %vm134_vm0, %v119_v36 }
  0x1b   :  { %2218 = vmatpush1.bf16.msra.mxu0 %v2675_v41  ;;  %235 = vmatprep.mubr.f32.mxu0 %v2503_v3 }
  0x1c   :  { %1936 = vmatmul.mubr.msk.f32.gmra.mrb[4].mxu1 %vm134_vm0, %v124_v47  ;;  %2220 = vmatprep.subr.bf16.mxu0 %v2678_v42 }
  0x1d   :  { %2190 = vmatpush1.bf16.msra.mxu1 %v2701_v48  ;;  %265 = vmatprep.mubr.f32.mxu1 %v2503_v3 }
  0x1e   :  { %2192 = vmatprep.subr.bf16.mxu1 %v2704_v49 }
  0x1f   :  { %2222 = vmatpush1.bf16.msra.mxu0 %v2701_v48 }
  0x20   :  { %1937 = vmatmul.mubr.msk.f32.gmra.mrb[6].mxu1 %vm134_vm0, %v125_v52  ;;  %2224 = vmatprep.subr.bf16.mxu0 %v2704_v49  ;;  %v396_v52 = vsub.f32 1.0, %v290_v51 }
  0x21   :  { %2194 = vmatpush1.bf16.msra.mxu1 %v2720_v53  ;;  %366 = vmatprep.mubr.f32.mxu1 %v2503_v3 }
  0x22   :  { %2196 = vmatprep.subr.bf16.mxu1 %v2630_v27  ;;  %v397_v54 = vmul.f32 0.0, %v396_v52 }
  0x23   :  { %2226 = vmatpush1.bf16.msra.mxu0 %v2720_v53 }
  0x24   :  { %367 = vmatmul.mubr.f32.vlgmr.msra.gmra.mrb[8].mxu1 %v2503_v3  ;;  %2244 = vmatprep.subr.bf16.mxu0 %v2630_v27 }
  0x25   :  { %2198 = vmatpush1.bf16.msra.mxu1 %v2647_v33  ;;  %474 = vmatprep.mubr.f32.mxu1 %v2503_v3 }
  0x26   :  { %2200 = vmatprep.subr.bf16.mxu1 %v2653_v35 }
  0x29   :  { %2202 = vmatpush1.bf16.msra.mxu1 %v2675_v41 }
  0x2a   :  { %2204 = vmatprep.subr.bf16.mxu1 %v2678_v42 }
  0x2d   :  { %2206 = vmatpush1.bf16.msra.mxu1 %v2701_v48 }
  0x2e   :  { %2208 = vmatprep.subr.bf16.mxu1 %v2704_v49 }
  0x31   :  { %2210 = vmatpush1.bf16.msra.mxu1 %v2720_v53 }
  0x32   :  { %2228 = vmatprep.subr.bf16.mxu1 %v2630_v27 }
  0xe7   :  { %v249_v61 = vpop.f32.mrb[0].mxu1  ;;  %v225_v62 = vpop.f32.mrb[0].mxu0 }
  0xe8   :  { %v2759_v63 = vadd.f32 %v249_v61, %v2753_v59  ;;  %v251_v0 = vpop.f32.mrb[1].mxu1  ;;  %v226_v1 = vadd.f32 %v225_v62, %v2753_v59  ;;  %v227_v2 = vpop.f32.mrb[1].mxu0 }
  0xe9   :  { %v252_v4 = vadd.f32 %v251_v0, %v2756_v60  ;;  %v228_v5 = vadd.f32 %v227_v2, %v2756_v60 }
  0xeb   :  { %281 = vst.msk [vmem:[#allocation2 + $0x48] sm:$0xff] %vm134_vm0, %v252_v4  ;;  %v255_v6 = vpop.f32.mrb[2].mxu1  ;;  %273 = vst.msk [vmem:[#allocation2 + $0x8] sm:$0xff] %vm134_vm0, %v228_v5 }
  0xec   :  { %v2767_v7 = vadd.f32 %v255_v6, %v2753_v59  ;;  %v257_v8 = vpop.f32.mrb[3].mxu1 }
  0xed   :  { %v258_v9 = vadd.f32 %v257_v8, %v2756_v60  ;;  %v231_v45 = vpop.f32.mrb[2].mxu0 }
  0xee   :  { %v232_v46 = vadd.f32 %v231_v45, %v2753_v59  ;;  %v233_v47 = vpop.f32.mrb[3].mxu0 }
  0xef   :  { %283 = vst.msk [vmem:[#allocation2 + $0x58] sm:$0xff] %vm134_vm0, %v258_v9  ;;  %v261_v10 = vpop.f32.mrb[4].mxu1  ;;  %v234_v50 = vadd.f32 %v233_v47, %v2756_v60 }
  0xf0   :  { %v2772_v11 = vadd.f32 %v261_v10, %v2753_v59  ;;  %v263_v12 = vpop.f32.mrb[5].mxu1 }
  0xf1   :  { %v264_v14 = vadd.f32 %v263_v12, %v2756_v60  ;;  %275 = vst.msk [vmem:[#allocation2 + $0x18] sm:$0xff] %vm134_vm0, %v234_v50 }
  0xf2   :  { %v289_v32 = vld [vmem:[#allocation2 + $0x8] sm:$0xff] }
  0xf3   :  { %285 = vst.msk [vmem:[#allocation2 + $0x68] sm:$0xff] %vm134_vm0, %v264_v14  ;;  %v267_v15 = vpop.f32.mrb[6].mxu1 }
  0xf4   :  { %v2780_v16 = vadd.f32 %v267_v15, %v2753_v59  ;;  %v269_v17 = vpop.f32.mrb[7].mxu1 }
  0xf5   :  { %v270_v19 = vadd.f32 %v269_v17, %v2756_v60  ;;  %v120_v17 = vld [vmem:[%s3296_s0 + $0x10] sm:$0xff] }
  0xf6   :  { %1932 = vmatmul.mubr.msk.f32.gmra.mrb[4].mxu0 %vm134_vm0, %v120_v17 }
  0xf7   :  { %287 = vst.msk [vmem:[#allocation2 + $0x78] sm:$0xff] %vm134_vm0, %v270_v19  ;;  %v368_v20 = vpop.f32.mrb[8].mxu1  ;;  %241 = vmatprep.mubr.f32.mxu0 %v2503_v3 }
  0xf8   :  { %v369_v21 = vadd.f32 %v368_v20, %v2783_v18  ;;  %v370_v22 = vpop.f32.mrb[9].mxu1  ;;  %v405_v14 = vld [vmem:[#allocation2 + $0x18] sm:$0xff] }
  0xf9   :  { %v371_v29 = vadd.f32 %v370_v22, %v2789_v28  ;;  %v121_v20 = vld [vmem:[%s3296_s0 + $0x18] sm:$0xff]  ;;  %s2511_s0 = smov 6  }
  0xfa   :  { %v373_v23 = vadd.f32 %v369_v21, %v226_v1  ;;  %1933 = vmatmul.mubr.msk.f32.gmra.mrb[6].mxu0 %vm134_vm0, %v121_v20 }
  0xfb   :  { %583 = vmatprep.mubr.f32.mxu0 %v2503_v3 }
  0xfc   :  { %v1938_v24 = vmul.f32 -1.442695, %v373_v23 }
  0xfe   :  { %2427 = vpow2.f32 %v1938_v24 }
 0x108   :  { %v2428_v25 = vpop.eup %2427 }
 0x109   :  { %v377_v26 = vadd.f32 1.0, %v2428_v25 }
 0x10b   :  { %2429 = vrcp.f32 %v377_v26 }
 0x115   :  { %v2430_v30 = vpop.eup %2429 }
 0x116   :  { %v380_v31 = vmul.f32 %v2430_v30, %v371_v29  ;;  %v383_v38 = vsub.f32 1.0, %v2430_v30  ;;  %v389_v40 = vmul.f32 0.0, %v2430_v30 }
 0x118   :  { %v381_v34 = vadd.f32 %v380_v31, %v289_v32 }
 0x11a   :  { %2431 = vtanh.f32 %v381_v34  ;;  %v2837_v34 = vld [vmem:[%s3297_s1 + $0x8] sm:$0xff] }
 0x11b   :  { %v507_v36 = vsub.f32 1.0, %v2837_v34  ;;  %vm1479_vm4 = vcmp.gt.f32.partialorder %v2837_v34, 0.5 }
 0x124   :  { %v2432_v37 = vpop.eup %2431 }
 0x125   :  { %385 = vrot.lane.b32.xlu0 %v2432_v37, %s2504_s25 }
 0x197   :  { %v386_v39 = vpop.permute.xlu0 %385 }
 0x198   :  { %v388_v43 = vmul.f32 %v386_v39, %v383_v38 }
 0x19a   :  { %v390_v44 = vadd.f32 %v389_v40, %v388_v43 }
 0x19c   :  { %392 = vrot.lane.b32.xlu0 %v390_v44, %s2504_s25 }
 0x1c9   :  { %v237_v29 = vpop.f32.mrb[4].mxu0 }
 0x1ca   :  { %v238_v30 = vadd.f32 %v237_v29, %v2753_v59  ;;  %v239_v31 = vpop.f32.mrb[5].mxu0 }
 0x1cb   :  { %v240_v32 = vadd.f32 %v239_v31, %v2756_v60 }
 0x1cd   :  { %277 = vst.msk [vmem:[#allocation2 + $0x28] sm:$0xff] %vm134_vm0, %v240_v32  ;;  %v243_v44 = vpop.f32.mrb[6].mxu0 }
 0x1ce   :  { %v244_v45 = vadd.f32 %v243_v44, %v2753_v59 }
 0x1d4   :  { %v514_v59 = vld [vmem:[#allocation2 + $0x28] sm:$0xff] }
 0x20e   :  { %v393_v57 = vpop.permute.xlu0 %392 }
 0x20f   :  { %v395_v58 = vmul.f32 %v393_v57, %v290_v51 }
 0x211   :  { %v398_v61 = vadd.f32 %v397_v54, %v395_v58 }
 0x213   :  { %v399_v62 = vmul.f32 %v398_v61, %v290_v51  ;;  %1939 = vmatmul.mubr.msk.f32.vlgmr.msra.gmra.mrb[10].mxu1 %vm134_vm0, %v398_v61  ;;  %v508_v38 = vmul.f32 %v507_v36, %v398_v61 }
 0x214   :  { %2230 = vmatpush1.bf16.msra.mxu1 %v2647_v33  ;;  %692 = vmatprep.mubr.f32.mxu1 %v2503_v3 }
 0x215   :  { %401 = vst.msk [vmem:[#allocation3] sm:$0xff] %vm400_vm1, %v399_v62  ;;  %2232 = vmatprep.subr.bf16.mxu1 %v2653_v35 }
 0x216   :  { %403 = vst.msk [vmem:[#allocation3 + $0x38] sm:$0xff] %vm402_vm2, %v399_v62 }
 0x218   :  { %2234 = vmatpush1.bf16.msra.mxu1 %v2675_v41 }
 0x219   :  { %2236 = vmatprep.subr.bf16.mxu1 %v2678_v42 }
 0x21c   :  { %2238 = vmatpush1.bf16.msra.mxu1 %v2701_v48 }
 0x21d   :  { %2240 = vmatprep.subr.bf16.mxu1 %v2704_v49 }
 0x220   :  { %2242 = vmatpush1.bf16.msra.mxu1 %v2720_v53 }
 0x221   :  { %2260 = vmatprep.subr.bf16.mxu1 %v2630_v27 }
 0x2e6   :  { %v476_v0 = vpop.f32.mrb[10].mxu1 }
 0x2e7   :  { %v477_v1 = vadd.f32 %v476_v0, %v2783_v18  ;;  %v478_v2 = vpop.f32.mrb[11].mxu1 }
 0x2e8   :  { %v479_v9 = vadd.f32 %v478_v2, %v2789_v28 }
 0x2e9   :  { %v481_v4 = vadd.f32 %v477_v1, %v232_v46  ;;  %v245_v46 = vpop.f32.mrb[7].mxu0 }
 0x2ea   :  { %v246_v47 = vadd.f32 %v245_v46, %v2756_v60 }
 0x2eb   :  { %v1940_v5 = vmul.f32 -1.442695, %v481_v4 }
 0x2ec   :  { %279 = vst.msk [vmem:[#allocation2 + $0x38] sm:$0xff] %vm134_vm0, %v246_v47  ;;  %v2891_v47 = vld [vmem:[%s3297_s1 + $0x18] sm:$0xff] }
 0x2ed   :  { %2433 = vpow2.f32 %v1940_v5  ;;  %vm1497_vm7 = vcmp.gt.f32.partialorder %v2891_v47, 0.5 }
 0x2f7   :  { %v2434_v6 = vpop.eup %2433 }
 0x2f8   :  { %v485_v8 = vadd.f32 1.0, %v2434_v6 }
 0x2fa   :  { %2435 = vrcp.f32 %v485_v8 }
 0x304   :  { %v2436_v10 = vpop.eup %2435 }
 0x305   :  { %v488_v12 = vmul.f32 %v2436_v10, %v479_v9  ;;  %v491_v22 = vsub.f32 1.0, %v2436_v10 }
 0x307   :  { %v489_v15 = vadd.f32 %v488_v12, %v405_v14  ;;  %v2866_v12 = vld [vmem:[%s3297_s1 + $0x10] sm:$0xff] }
 0x308   :  { %v616_v14 = vsub.f32 1.0, %v2866_v12  ;;  %vm1488_vm5 = vcmp.gt.f32.partialorder %v2866_v12, 0.5 }
 0x309   :  { %2437 = vtanh.f32 %v489_v15 }
 0x313   :  { %v2438_v19 = vpop.eup %2437 }
 0x314   :  { %493 = vrot.lane.b32.xlu1 %v2438_v19, %s2504_s25 }
 0x318   :  { %497 = vrot.lane.b32.xlu1 %v398_v61, %s2504_s25 }
 0x386   :  { %v494_v21 = vpop.permute.xlu1 %493 }
 0x387   :  { %v496_v24 = vmul.f32 %v494_v21, %v491_v22 }
 0x38a   :  { %v498_v23 = vpop.permute.xlu1 %497 }
 0x38b   :  { %v500_v25 = vmul.f32 %v2436_v10, %v498_v23 }
 0x38d   :  { %v501_v26 = vadd.f32 %v500_v25, %v496_v24 }
 0x38f   :  { %503 = vrot.lane.b32.xlu0 %v501_v26, %s2504_s25 }
 0x401   :  { %v504_v37 = vpop.permute.xlu0 %503 }
 0x402   :  { %v506_v39 = vmul.f32 %v504_v37, %v2837_v34  ;;  %v623_v37 = vld [vmem:[#allocation2 + $0x38] sm:$0xff] }
 0x404   :  { %v509_v40 = vadd.f32 %v508_v38, %v506_v39 }
 0x406   :  { %v510_v43 = vmul.f32 %v509_v40, %v2837_v34  ;;  %606 = vrot.lane.b32.xlu0 %v509_v40, %s2504_s25  ;;  %1941 = vmatmul.mubr.msk.f32.vlgmr.msra.gmra.mrb[8].mxu0 %vm134_vm0, %v509_v40  ;;  %v617_v17 = vmul.f32 %v616_v14, %v509_v40 }
 0x407   :  { %2246 = vmatpush1.bf16.msra.mxu0 %v2647_v33  ;;  %801 = vmatprep.mubr.f32.mxu0 %v2503_v3 }
 0x408   :  { %511 = vst.msk [vmem:[#allocation3 + $0x8] sm:$0xff] %vm400_vm1, %v510_v43  ;;  %2248 = vmatprep.subr.bf16.mxu0 %v2653_v35 }
 0x409   :  { %512 = vst.msk [vmem:[#allocation3 + $0x30] sm:$0xff] %vm402_vm2, %v510_v43 }
 0x40b   :  { %2250 = vmatpush1.bf16.msra.mxu0 %v2675_v41 }
 0x40c   :  { %2252 = vmatprep.subr.bf16.mxu0 %v2678_v42 }
 0x40f   :  { %2254 = vmatpush1.bf16.msra.mxu0 %v2701_v48 }
 0x410   :  { %2256 = vmatprep.subr.bf16.mxu0 %v2704_v49 }
 0x413   :  { %2258 = vmatpush1.bf16.msra.mxu0 %v2720_v53 }
 0x414   :  { %2276 = vmatprep.subr.bf16.mxu0 %v2630_v27 }
 0x478   :  { %v607_v5 = vpop.permute.xlu0 %606 }
 0x4d9   :  { %v585_v50 = vpop.f32.mrb[8].mxu0 }
 0x4da   :  { %v586_v51 = vadd.f32 %v585_v50, %v2783_v18  ;;  %v587_v52 = vpop.f32.mrb[9].mxu0  ;;  %v725_v50 = vsub.f32 1.0, %v2891_v47 }
 0x4db   :  { %v588_v62 = vadd.f32 %v587_v52, %v2789_v28 }
 0x4dc   :  { %v590_v54 = vadd.f32 %v586_v51, %v238_v30 }
 0x4de   :  { %v1942_v57 = vmul.f32 -1.442695, %v590_v54 }
 0x4e0   :  { %2439 = vpow2.f32 %v1942_v57 }
 0x4ea   :  { %v2440_v58 = vpop.eup %2439 }
 0x4eb   :  { %v594_v61 = vadd.f32 1.0, %v2440_v58 }
 0x4ed   :  { %2441 = vrcp.f32 %v594_v61 }
 0x4f7   :  { %v2442_v0 = vpop.eup %2441 }
 0x4f8   :  { %v597_v1 = vmul.f32 %v2442_v0, %v588_v62  ;;  %v600_v4 = vsub.f32 1.0, %v2442_v0  ;;  %v609_v8 = vmul.f32 %v2442_v0, %v607_v5 }
 0x4fa   :  { %v598_v2 = vadd.f32 %v597_v1, %v514_v59 }
 0x4fc   :  { %2443 = vtanh.f32 %v598_v2 }
 0x506   :  { %v2444_v60 = vpop.eup %2443 }
 0x507   :  { %602 = vrot.lane.b32.xlu1 %v2444_v60, %s2504_s25 }
 0x579   :  { %v603_v6 = vpop.permute.xlu1 %602 }
 0x57a   :  { %v605_v9 = vmul.f32 %v603_v6, %v600_v4 }
 0x57c   :  { %v610_v10 = vadd.f32 %v609_v8, %v605_v9  ;;  %v732_v8 = vld [vmem:[#allocation2 + $0x48] sm:$0xff] }
 0x57e   :  { %612 = vrot.lane.b32.xlu1 %v610_v10, %s2504_s25 }
 0x5f0   :  { %v613_v15 = vpop.permute.xlu1 %612 }
 0x5f1   :  { %v615_v19 = vmul.f32 %v613_v15, %v2866_v12 }
 0x5f3   :  { %v618_v20 = vadd.f32 %v617_v17, %v615_v19 }
 0x5f5   :  { %v619_v21 = vmul.f32 %v618_v20, %v2866_v12  ;;  %715 = vrot.lane.b32.xlu1 %v618_v20, %s2504_s25  ;;  %1943 = vmatmul.mubr.msk.f32.vlgmr.msra.gmra.mrb[12].mxu1 %vm134_vm0, %v618_v20  ;;  %v726_v52 = vmul.f32 %v725_v50, %v618_v20 }
 0x5f6   :  { %2262 = vmatpush1.bf16.msra.mxu1 %v2647_v33  ;;  %910 = vmatprep.mubr.f32.mxu1 %v2503_v3 }
 0x5f7   :  { %620 = vst.msk [vmem:[#allocation3 + $0x10] sm:$0xff] %vm400_vm1, %v619_v21  ;;  %2264 = vmatprep.subr.bf16.mxu1 %v2653_v35 }
 0x5f8   :  { %621 = vst.msk [vmem:[#allocation3 + $0x28] sm:$0xff] %vm402_vm2, %v619_v21  ;;  %v2916_v21 = vld [vmem:[%s3297_s1 + $0x20] sm:$0xff] }
 0x5f9   :  { %vm1506_vm6 = vcmp.gt.f32.partialorder %v2916_v21, 0.5 }
 0x5fa   :  { %2266 = vmatpush1.bf16.msra.mxu1 %v2675_v41 }
 0x5fb   :  { %2268 = vmatprep.subr.bf16.mxu1 %v2678_v42 }
 0x5fe   :  { %2270 = vmatpush1.bf16.msra.mxu1 %v2701_v48 }
 0x5ff   :  { %2272 = vmatprep.subr.bf16.mxu1 %v2704_v49 }
 0x602   :  { %2274 = vmatpush1.bf16.msra.mxu1 %v2720_v53 }
 0x603   :  { %2292 = vmatprep.subr.bf16.mxu1 %v2630_v27 }
 0x667   :  { %v716_v40 = vpop.permute.xlu1 %715 }
 0x6c8   :  { %v694_v22 = vpop.f32.mrb[12].mxu1 }
 0x6c9   :  { %v695_v23 = vadd.f32 %v694_v22, %v2783_v18  ;;  %v696_v24 = vpop.f32.mrb[13].mxu1  ;;  %v834_v22 = vsub.f32 1.0, %v2916_v21 }
 0x6ca   :  { %v697_v31 = vadd.f32 %v696_v24, %v2789_v28 }
 0x6cb   :  { %v699_v25 = vadd.f32 %v695_v23, %v244_v45 }
 0x6cd   :  { %v1944_v26 = vmul.f32 -1.442695, %v699_v25 }
 0x6cf   :  { %2445 = vpow2.f32 %v1944_v26 }
 0x6d9   :  { %v2446_v29 = vpop.eup %2445 }
 0x6da   :  { %v703_v30 = vadd.f32 1.0, %v2446_v29 }
 0x6dc   :  { %2447 = vrcp.f32 %v703_v30 }
 0x6e6   :  { %v2448_v32 = vpop.eup %2447 }
 0x6e7   :  { %v706_v36 = vmul.f32 %v2448_v32, %v697_v31  ;;  %v709_v27 = vsub.f32 1.0, %v2448_v32  ;;  %v718_v44 = vmul.f32 %v2448_v32, %v716_v40 }
 0x6e9   :  { %v707_v38 = vadd.f32 %v706_v36, %v623_v37 }
 0x6eb   :  { %2449 = vtanh.f32 %v707_v38 }
 0x6f5   :  { %v2450_v39 = vpop.eup %2449 }
 0x6f6   :  { %711 = vrot.lane.b32.xlu0 %v2450_v39, %s2504_s25 }
 0x768   :  { %v712_v43 = vpop.permute.xlu0 %711 }
 0x769   :  { %v714_v45 = vmul.f32 %v712_v43, %v709_v27 }
 0x76b   :  { %v719_v46 = vadd.f32 %v718_v44, %v714_v45  ;;  %v2941_v45 = vld [vmem:[%s3297_s1 + $0x28] sm:$0xff] }
 0x76c   :  { %vm1515_vm9 = vcmp.gt.f32.partialorder %v2941_v45, 0.5 }
 0x76d   :  { %721 = vrot.lane.b32.xlu0 %v719_v46, %s2504_s25  ;;  %v943_v46 = vsub.f32 1.0, %v2941_v45 }
 0x7df   :  { %v722_v51 = vpop.permute.xlu0 %721 }
 0x7e0   :  { %v724_v54 = vmul.f32 %v722_v51, %v2891_v47 }
 0x7e2   :  { %v727_v57 = vadd.f32 %v726_v52, %v724_v54 }
 0x7e4   :  { %v728_v58 = vmul.f32 %v727_v57, %v2891_v47  ;;  %824 = vrot.lane.b32.xlu0 %v727_v57, %s2504_s25  ;;  %1945 = vmatmul.mubr.msk.f32.vlgmr.msra.gmra.mrb[10].mxu0 %vm134_vm0, %v727_v57  ;;  %v835_v24 = vmul.f32 %v834_v22, %v727_v57 }
 0x7e5   :  { %2278 = vmatpush1.bf16.msra.mxu0 %v2647_v33  ;;  %1019 = vmatprep.mubr.f32.mxu0 %v2503_v3 }
 0x7e6   :  { %729 = vst.msk [vmem:[#allocation3 + $0x18] sm:$0xff] %vm400_vm1, %v728_v58  ;;  %2280 = vmatprep.subr.bf16.mxu0 %v2653_v35 }
 0x7e7   :  { %730 = vst.msk [vmem:[#allocation3 + $0x20] sm:$0xff] %vm402_vm2, %v728_v58 }
 0x7e9   :  { %2282 = vmatpush1.bf16.msra.mxu0 %v2675_v41 }
 0x7ea   :  { %2284 = vmatprep.subr.bf16.mxu0 %v2678_v42 }
 0x7ed   :  { %2286 = vmatpush1.bf16.msra.mxu0 %v2701_v48 }
 0x7ee   :  { %2288 = vmatprep.subr.bf16.mxu0 %v2704_v49 }
 0x7f1   :  { %2290 = vmatpush1.bf16.msra.mxu0 %v2720_v53 }
 0x856   :  { %v825_v15 = vpop.permute.xlu0 %824 }
 0x8b7   :  { %v803_v61 = vpop.f32.mrb[10].mxu0 }
 0x8b8   :  { %v804_v62 = vadd.f32 %v803_v61, %v2783_v18  ;;  %v805_v0 = vpop.f32.mrb[11].mxu0 }
 0x8b9   :  { %v806_v4 = vadd.f32 %v805_v0, %v2789_v28 }
 0x8ba   :  { %v808_v1 = vadd.f32 %v804_v62, %v2759_v63 }
 0x8bc   :  { %v1946_v59 = vmul.f32 -1.442695, %v808_v1 }
 0x8be   :  { %2451 = vpow2.f32 %v1946_v59 }
 0x8c8   :  { %v2452_v2 = vpop.eup %2451 }
 0x8c9   :  { %v812_v60 = vadd.f32 1.0, %v2452_v2 }
 0x8cb   :  { %2453 = vrcp.f32 %v812_v60 }
 0x8d5   :  { %v2454_v5 = vpop.eup %2453 }
 0x8d6   :  { %v815_v6 = vmul.f32 %v2454_v5, %v806_v4  ;;  %v818_v14 = vsub.f32 1.0, %v2454_v5  ;;  %v827_v19 = vmul.f32 %v2454_v5, %v825_v15 }
 0x8d8   :  { %v816_v9 = vadd.f32 %v815_v6, %v732_v8  ;;  %v950_v6 = vld [vmem:[#allocation2 + $0x68] sm:$0xff] }
 0x8da   :  { %2455 = vtanh.f32 %v816_v9 }
 0x8e4   :  { %v2456_v10 = vpop.eup %2455 }
 0x8e5   :  { %820 = vrot.lane.b32.xlu1 %v2456_v10, %s2504_s25 }
 0x957   :  { %v821_v17 = vpop.permute.xlu1 %820 }
 0x958   :  { %v823_v63 = vmul.f32 %v821_v17, %v818_v14 }
 0x95a   :  { %v828_v20 = vadd.f32 %v827_v19, %v823_v63  ;;  %v2958_v63 = vld [vmem:[%s3297_s1 + $0x30] sm:$0xff] }
 0x95b   :  { %vm1524_vm8 = vcmp.gt.f32.partialorder %v2958_v63, 0.5 }
 0x95c   :  { %830 = vrot.lane.b32.xlu1 %v828_v20, %s2504_s25  ;;  %v1052_v20 = vsub.f32 1.0, %v2958_v63 }
 0x9ce   :  { %v831_v23 = vpop.permute.xlu1 %830 }
 0x9cf   :  { %v833_v25 = vmul.f32 %v831_v23, %v2916_v21 }
 0x9d1   :  { %v836_v26 = vadd.f32 %v835_v24, %v833_v25 }
 0x9d3   :  { %v837_v29 = vmul.f32 %v836_v26, %v2916_v21  ;;  %933 = vrot.lane.b32.xlu1 %v836_v26, %s2504_s25  ;;  %1947 = vmatmul.mubr.msk.f32.vlgmr.msra.gmra.mrb[14].mxu1 %vm134_vm0, %v836_v26  ;;  %v944_v51 = vmul.f32 %v943_v46, %v836_v26  ;;  %v68_v46 = vld [vmem:[%s3298_s4 + $0x28] sm:$0xff] }
 0x9d4   :  { %2294 = vmatpush1.bf16.msra.mxu1 %v2647_v33  ;;  %1128 = vmatprep.mubr.f32.mxu1 %v2503_v3 }
 0x9d5   :  { %838 = vst.msk [vmem:[#allocation3 + $0x20] sm:$0xff] %vm400_vm1, %v837_v29  ;;  %2296 = vmatprep.subr.bf16.mxu1 %v2653_v35 }
 0x9d6   :  { %839 = vst.msk [vmem:[#allocation3 + $0x18] sm:$0xff] %vm402_vm2, %v837_v29 }
 0x9d8   :  { %2298 = vmatpush1.bf16.msra.mxu1 %v2675_v41 }
 0x9d9   :  { %2300 = vmatprep.subr.bf16.mxu1 %v2678_v42 }
 0x9dc   :  { %2302 = vmatpush1.bf16.msra.mxu1 %v2701_v48  ;;  %v841_v48 = vld [vmem:[#allocation2 + $0x58] sm:$0xff] }
 0x9dd   :  { %2304 = vmatprep.subr.bf16.mxu1 %v2704_v49 }
 0x9e0   :  { %2306 = vmatpush1.bf16.msra.mxu1 %v2720_v53 }
 0xa45   :  { %v934_v27 = vpop.permute.xlu1 %933 }
 0xaa6   :  { %v912_v30 = vpop.f32.mrb[14].mxu1 }
 0xaa7   :  { %v913_v33 = vadd.f32 %v912_v30, %v2783_v18  ;;  %v914_v31 = vpop.f32.mrb[15].mxu1 }
 0xaa8   :  { %v915_v41 = vadd.f32 %v914_v31, %v2789_v28 }
 0xaa9   :  { %v917_v32 = vadd.f32 %v913_v33, %v2767_v7 }
 0xaab   :  { %v1948_v36 = vmul.f32 -1.442695, %v917_v32 }
 0xaad   :  { %2457 = vpow2.f32 %v1948_v36 }
 0xab7   :  { %v2458_v37 = vpop.eup %2457 }
 0xab8   :  { %v921_v35 = vadd.f32 1.0, %v2458_v37 }
 0xaba   :  { %2459 = vrcp.f32 %v921_v35 }
 0xac4   :  { %v2460_v42 = vpop.eup %2459 }
 0xac5   :  { %v924_v38 = vmul.f32 %v2460_v42, %v915_v41  ;;  %v927_v53 = vsub.f32 1.0, %v2460_v42  ;;  %v936_v43 = vmul.f32 %v2460_v42, %v934_v27  ;;  %v71_v27 = vld [vmem:[%s3298_s4 + $0x40] sm:$0xff] }
 0xac7   :  { %v925_v39 = vadd.f32 %v924_v38, %v841_v48  ;;  %v1059_v38 = vld [vmem:[#allocation2 + $0x78] sm:$0xff] }
 0xac9   :  { %2461 = vtanh.f32 %v925_v39  ;;  %v2505_v39 = vmov 0.0|0.0  }
 0xaca   :  { %2307 = vmatprep.subr.bf16.mxu0 %v2505_v39 }
 0xad3   :  { %v2462_v49 = vpop.eup %2461 }
 0xad4   :  { %929 = vrot.lane.b32.xlu0 %v2462_v49, %s2504_s25 }
 0xb46   :  { %v930_v40 = vpop.permute.xlu0 %929 }
 0xb47   :  { %v932_v7 = vmul.f32 %v930_v40, %v927_v53  ;;  %v66_v53 = vld [vmem:[%s3298_s4 + $0x18] sm:$0xff]  ;;  %v72_v40 = vld [vmem:[%s3298_s4 + $0x48] sm:$0xff] }
 0xb49   :  { %v937_v44 = vadd.f32 %v936_v43, %v932_v7  ;;  %v2319_v7 = vpack.c.bf16 %v72_v40, %v71_v27  ;;  %v97_v27 = vld [vmem:[%s3299_s5 + $0x68] sm:$0xff] }
 0xb4b   :  { %939 = vrot.lane.b32.xlu0 %v937_v44, %s2504_s25  ;;  %v67_v44 = vld [vmem:[%s3298_s4 + $0x20] sm:$0xff]  ;;  %2320 = vmatprep.subr.bf16.mxu1 %v2319_v7 }
 0xbbd   :  { %v940_v50 = vpop.permute.xlu0 %939 }
 0xbbe   :  { %v942_v52 = vmul.f32 %v940_v50, %v2941_v45 }
 0xbc0   :  { %v945_v54 = vadd.f32 %v944_v51, %v942_v52  ;;  %v2314_v51 = vpack.c.bf16 %v68_v46, %v67_v44  ;;  %v69_v52 = vld [vmem:[%s3298_s4 + $0x30] sm:$0xff]  ;;  %v99_v46 = vld [vmem:[%s3299_s5 + $0x78] sm:$0xff] }
 0xbc1   :  { %v98_v44 = vld [vmem:[%s3299_s5 + $0x70] sm:$0xff] }
 0xbc2   :  { %v946_v57 = vmul.f32 %v945_v54, %v2941_v45  ;;  %1042 = vrot.lane.b32.xlu0 %v945_v54, %s2504_s25  ;;  %1949 = vmatmul.mubr.msk.f32.vlgmr.msra.gmra.mrb[12].mxu0 %vm134_vm0, %v945_v54  ;;  %v1053_v23 = vmul.f32 %v1052_v20, %v945_v54  ;;  %v70_v54 = vld [vmem:[%s3298_s4 + $0x38] sm:$0xff] }
 0xbc3   :  { %2048 = vmatprep.mubr.msk.f32.mxu0 %vm2506_vm3, %v2503_v3 }
 0xbc4   :  { %947 = vst.msk [vmem:[#allocation3 + $0x28] sm:$0xff] %vm400_vm1, %v946_v57 }
 0xbc5   :  { %948 = vst.msk [vmem:[#allocation3 + $0x10] sm:$0xff] %vm402_vm2, %v946_v57  ;;  %v2317_v57 = vpack.c.bf16 %v70_v54, %v69_v52  ;;  %v2363_v52 = vpack.c.bf16 %v99_v46, %v98_v44 }
 0xc34   :  { %v1043_v14 = vpop.permute.xlu0 %1042 }
 0xc95   :  { %v1021_v58 = vpop.f32.mrb[12].mxu0 }
 0xc96   :  { %v1022_v61 = vadd.f32 %v1021_v58, %v2783_v18  ;;  %v1023_v62 = vpop.f32.mrb[13].mxu0  ;;  %v73_v58 = vld [vmem:[%s3298_s4 + $0x50] sm:$0xff] }
 0xc97   :  { %v1024_v60 = vadd.f32 %v1023_v62, %v2789_v28 }
 0xc98   :  { %v1026_v0 = vadd.f32 %v1022_v61, %v2772_v11  ;;  %v74_v61 = vld [vmem:[%s3298_s4 + $0x58] sm:$0xff] }
 0xc99   :  { %v2323_v62 = vpack.c.bf16 %v74_v61, %v73_v58 }
 0xc9a   :  { %v1950_v1 = vmul.f32 -1.442695, %v1026_v0  ;;  %v75_v0 = vld [vmem:[%s3298_s4 + $0x60] sm:$0xff] }
 0xc9c   :  { %2463 = vpow2.f32 %v1950_v1  ;;  %v76_v1 = vld [vmem:[%s3298_s4 + $0x68] sm:$0xff] }
 0xca6   :  { %v2464_v59 = vpop.eup %2463 }
 0xca7   :  { %v1030_v2 = vadd.f32 1.0, %v2464_v59  ;;  %v2327_v59 = vpack.c.bf16 %v76_v1, %v75_v0 }
 0xca9   :  { %2465 = vrcp.f32 %v1030_v2  ;;  %v77_v2 = vld [vmem:[%s3298_s4 + $0x70] sm:$0xff] }
 0xcb3   :  { %v2466_v4 = vpop.eup %2465 }
 0xcb4   :  { %v1033_v5 = vmul.f32 %v2466_v4, %v1024_v60  ;;  %v1036_v10 = vsub.f32 1.0, %v2466_v4  ;;  %v1045_v17 = vmul.f32 %v2466_v4, %v1043_v14  ;;  %v78_v60 = vld [vmem:[%s3298_s4 + $0x78] sm:$0xff] }
 0xcb6   :  { %v1034_v8 = vadd.f32 %v1033_v5, %v950_v6  ;;  %v2331_v5 = vpack.c.bf16 %v78_v60, %v77_v2 }
 0xcb8   :  { %2467 = vtanh.f32 %v1034_v8 }
 0xcc2   :  { %v2468_v9 = vpop.eup %2467 }
 0xcc3   :  { %1038 = vrot.lane.b32.xlu1 %v2468_v9, %s2504_s25 }
 0xd35   :  { %v1039_v15 = vpop.permute.xlu1 %1038 }
 0xd36   :  { %v1041_v11 = vmul.f32 %v1039_v15, %v1036_v10  ;;  %v3036_v15 = vld [vmem:[%s3297_s1 + $0x38] sm:$0xff] }
 0xd37   :  { %vm1533_vm10 = vcmp.gt.f32.partialorder %v3036_v15, 0.5 }
 0xd38   :  { %v1046_v19 = vadd.f32 %v1045_v17, %v1041_v11  ;;  %v1161_v17 = vsub.f32 1.0, %v3036_v15 }
 0xd3a   :  { %1048 = vrot.lane.b32.xlu1 %v1046_v19, %s2504_s25 }
 0xdac   :  { %v1049_v22 = vpop.permute.xlu1 %1048 }
 0xdad   :  { %v1051_v24 = vmul.f32 %v1049_v22, %v2958_v63 }
 0xdaf   :  { %v2962_v25 = vadd.f32 %v1053_v23, %v1051_v24 }
 0xdb1   :  { %v1055_v26 = vmul.f32 %v2962_v25, %v2958_v63  ;;  %1151 = vrot.lane.b32.xlu1 %v2962_v25, %s2504_s25  ;;  %1951 = vmatmul.mubr.msk.f32.vlgmr.msra.gmra.mrb[16].mxu1 %vm134_vm0, %v2962_v25  ;;  %v1162_v19 = vmul.f32 %v1161_v17, %v2962_v25  ;;  %v1463_v17 = vsub.s32 2, %v2741_v55  ;;  %v1469_v63 = vld [vmem:[%s3297_s1] sm:$0xff] }
 0xdb2   :  { %2322 = vmatpush3.bf16.msra.mxu1 %v2319_v7  ;;  %vm1470_vm11 = vcmp.gt.f32.partialorder %v1469_v63, 0.5  ;;  %v95_v63 = vld [vmem:[%s3299_s5 + $0x58] sm:$0xff] }
 0xdb3   :  { %1056 = vst.msk [vmem:[#allocation3 + $0x30] sm:$0xff] %vm400_vm1, %v1055_v26  ;;  %2324 = vmatprep.subr.bf16.mxu1 %v2323_v62 }
 0xdb4   :  { %1057 = vst.msk [vmem:[#allocation3 + $0x8] sm:$0xff] %vm402_vm2, %v1055_v26  ;;  %v3055_v26 = vld [vmem:[#allocation3 + $0x10] sm:$0xff] }
 0xdb6   :  { %2326 = vmatpush3.bf16.msra.mxu1 %v2323_v62 }
 0xdb7   :  { %2328 = vmatprep.subr.bf16.mxu1 %v2327_v59 }
 0xdba   :  { %2330 = vmatpush3.bf16.msra.mxu1 %v2327_v59 }
 0xdbb   :  { %2332 = vmatprep.subr.bf16.mxu1 %v2331_v5  ;;  %v3051_v25 = vld [vmem:[#allocation3 + $0x8] sm:$0xff] }
 0xdbe   :  { %2334 = vmatpush3.bf16.msra.mxu1 %v2331_v5 }
 0xdbf   :  { %2341 = vmatprep.subr.bf16.mxu1 %v2505_v39 }
 0xe23   :  { %v1152_v6 = vpop.permute.xlu1 %1151 }
 0xe84   :  { %v1130_v29 = vpop.f32.mrb[16].mxu1 }
 0xe85   :  { %v1131_v30 = vadd.f32 %v1130_v29, %v2783_v18  ;;  %v1132_v33 = vpop.f32.mrb[17].mxu1  ;;  %v63_v18 = vld [vmem:[%s3298_s4] sm:$0xff]  ;;  %v3059_v29 = vld [vmem:[#allocation3 + $0x18] sm:$0xff] }
 0xe86   :  { %v1133_v35 = vadd.f32 %v1132_v33, %v2789_v28  ;;  %v65_v28 = vld [vmem:[%s3298_s4 + $0x10] sm:$0xff]  ;;  %v3067_v33 = vld [vmem:[#allocation3 + $0x28] sm:$0xff] }
 0xe87   :  { %v1135_v31 = vadd.f32 %v1131_v30, %v2780_v16  ;;  %v64_v16 = vld [vmem:[%s3298_s4 + $0x8] sm:$0xff]  ;;  %v2311_v43 = vpack.c.bf16 %v66_v53, %v65_v28  ;;  %v3063_v30 = vld [vmem:[#allocation3 + $0x20] sm:$0xff] }
 0xe88   :  { %v2308_v49 = vpack.c.bf16 %v64_v16, %v63_v18  ;;  %v96_v53 = vld [vmem:[%s3299_s5 + $0x60] sm:$0xff] }
 0xe89   :  { %v1952_v32 = vmul.f32 -1.442695, %v1135_v31  ;;  %v3071_v31 = vld [vmem:[#allocation3 + $0x30] sm:$0xff] }
 0xe8a   :  { %2309 = vmatpush3.bf16.msra.mxu0 %v2308_v49 }
 0xe8b   :  { %2469 = vpow2.f32 %v1952_v32  ;;  %2310 = vmatprep.subr.bf16.mxu0 %v2505_v39 }
 0xe8e   :  { %2312 = vmatpush3.bf16.msra.mxu0 %v2311_v43  ;;  %v2360_v43 = vpack.c.bf16 %v97_v27, %v96_v53 }
 0xe8f   :  { %2313 = vmatprep.subr.bf16.mxu0 %v2505_v39 }
 0xe92   :  { %2315 = vmatpush3.bf16.msra.mxu0 %v2314_v51 }
 0xe93   :  { %2316 = vmatprep.subr.bf16.mxu0 %v2505_v39 }
 0xe95   :  { %v2470_v36 = vpop.eup %2469 }
 0xe96   :  { %v1139_v37 = vadd.f32 1.0, %v2470_v36  ;;  %2318 = vmatpush3.bf16.msra.mxu0 %v2317_v57  ;;  %v79_v36 = vld [vmem:[%s3298_s4 + $0x80] sm:$0xff] }
 0xe97   :  { %2335 = vmatprep.subr.bf16.mxu0 %v2505_v39 }
 0xe98   :  { %2471 = vrcp.f32 %v1139_v37  ;;  %v80_v37 = vld [vmem:[%s3298_s4 + $0x88] sm:$0xff] }
 0xea2   :  { %v2472_v41 = vpop.eup %2471 }
 0xea3   :  { %v1142_v42 = vmul.f32 %v2472_v41, %v1133_v35  ;;  %v1145_v4 = vsub.f32 1.0, %v2472_v41  ;;  %v1154_v9 = vmul.f32 %v2472_v41, %v1152_v6  ;;  %v81_v35 = vld [vmem:[%s3298_s4 + $0x90] sm:$0xff]  ;;  %v2336_v41 = vpack.c.bf16 %v80_v37, %v79_v36 }
 0xea5   :  { %v1143_v48 = vadd.f32 %v1142_v42, %v1059_v38  ;;  %v82_v42 = vld [vmem:[%s3298_s4 + $0x98] sm:$0xff] }
 0xea6   :  { %v2339_v38 = vpack.c.bf16 %v82_v42, %v81_v35 }
 0xea7   :  { %2473 = vtanh.f32 %v1143_v48  ;;  %v83_v48 = vld [vmem:[%s3298_s4 + $0xa0] sm:$0x7] }
 0xea8   :  { %v1170_v18 = vrot.slane %v83_v48, %v2744_v56  ;;  %v1385_v0 = vrot.slane %v83_v48, %v2775_v13 }
 0xeb1   :  { %v2474_v50 = vpop.eup %2473 }
 0xeb2   :  { %1147 = vrot.lane.b32.xlu0 %v2474_v50, %s2504_s25 }
 0xf24   :  { %v1148_v8 = vpop.permute.xlu0 %1147 }
 0xf25   :  { %v1150_v10 = vmul.f32 %v1148_v8, %v1145_v4 }
 0xf27   :  { %v1155_v14 = vadd.f32 %v1154_v9, %v1150_v10 }
 0xf29   :  { %1157 = vrot.lane.b32.xlu0 %v1155_v14, %s2504_s25 }
 0xf9b   :  { %v1158_v11 = vpop.permute.xlu0 %1157 }
 0xf9c   :  { %v1160_v20 = vmul.f32 %v1158_v11, %v3036_v15 }
 0xf9e   :  { %v1163_v22 = vadd.f32 %v1162_v19, %v1160_v20  ;;  %v1464_v19 = vrot.slane %v83_v48, %v1463_v17 }
 0xfa0   :  { %v1164_v23 = vmul.f32 %v1163_v22, %v3036_v15  ;;  %2049 = vmatmul.mubr.msk.f32.vlgmr.msra.gmra.mrb[14].mxu0 %vm134_vm0, %v1163_v22 }
 0xfa1   :  { %2087 = vmatprep.mubr.msk.f32.mxu0 %vm2506_vm3, %v2503_v3  ;;  %2337 = vmatpush3.bf16.msra.mxu0 %v2336_v41 }
 0xfa2   :  { %1165 = vst.msk [vmem:[#allocation3 + $0x38] sm:$0xff] %vm400_vm1, %v1164_v23  ;;  %2338 = vmatprep.subr.bf16.mxu0 %v2505_v39 }
 0xfa3   :  { %1166 = vst.msk [vmem:[#allocation3] sm:$0xff] %vm402_vm2, %v1164_v23  ;;  %vm1573_vm2 = vcmask 48128  }
 0xfa5   :  { %2340 = vmatpush3.bf16.msra.mxu0 %v2339_v38 }
 0xfa6   :  { %2359 = vmatprep.subr.bf16.mxu0 %v2505_v39 }
 0xfa9   :  { %v3075_v32 = vld [vmem:[#allocation3 + $0x38] sm:$0xff] }
 0xfaa   :  { %v3047_v24 = vld [vmem:[#allocation3] sm:$0xff] }
 0xfab   :  { %2067 = vmatprep.mubr.msk.f32.mxu1 %vm134_vm0, %v3047_v24 }
 0xfac   :  { %2068 = vmatmul.mubr.msk.f32.vlgmr.msra.gmra.mrb[18].mxu1 %vm134_vm0, %v3051_v25 }
 0xfad   :  { %2070 = vmatprep.mubr.msk.f32.mxu1 %vm134_vm0, %v3055_v26 }
 0xfb0   :  { %2071 = vmatmul.mubr.msk.f32.gmra.mrb[20].mxu1 %vm134_vm0, %v3059_v29 }
 0xfb1   :  { %2073 = vmatprep.mubr.msk.f32.mxu1 %vm134_vm0, %v3063_v30 }
 0xfb4   :  { %2074 = vmatmul.mubr.msk.f32.gmra.mrb[22].mxu1 %vm134_vm0, %v3067_v33 }
 0xfb5   :  { %2076 = vmatprep.mubr.msk.f32.mxu1 %vm134_vm0, %v3071_v31 }
 0xfb8   :  { %2077 = vmatmul.mubr.msk.f32.gmra.mrb[24].mxu1 %vm134_vm0, %v3075_v32  ;;  %vm1571_vm0 = vcmask 39936  }
 0xfb9   :  { %2114 = vmatprep.mubr.msk.f32.mxu1 %vm2506_vm3, %v2503_v3 }
0x1073   :  { %v1240_v16 = vpop.f32.mrb[14].mxu0 }
0x1074   :  { %v1241_v28 = vadd.f32 %v1240_v16, %v1170_v18  ;;  %v2050_v49 = vpop.f32.mrb[15].mxu0 }
0x1076   :  { %2475 = vtanh.f32 %v1241_v28 }
0x107f   :  { %v2069_v40 = vpop.f32.mrb[18].mxu1 }
0x1080   :  { %v1343_v7 = vpop.f32.mrb[19].mxu1  ;;  %v3111_v50 = vpop.eup %2475 }
0x1081   :  { %2088 = vmatmul.mubr.msk.f32.vlgmr.msra.gmra.mrb[16].mxu0 %vm400_vm1, %v3111_v50 }
0x1082   :  { %2361 = vmatpush3.bf16.msra.mxu0 %v2360_v43  ;;  %2125 = vmatprep.mubr.msk.f32.mxu0 %vm2506_vm3, %v2503_v3 }
0x1083   :  { %v2072_v51 = vpop.f32.mrb[20].mxu1  ;;  %2362 = vmatprep.subr.bf16.mxu0 %v2505_v39 }
0x1084   :  { %v1353_v54 = vpop.f32.mrb[21].mxu1 }
0x1086   :  { %2364 = vmatpush3.bf16.msra.mxu0 %v2363_v52 }
0x1087   :  { %v2075_v57 = vpop.f32.mrb[22].mxu1  ;;  %2365 = vmatprep.subr.bf16.mxu0 %v2505_v39 }
0x1088   :  { %v1363_v58 = vpop.f32.mrb[23].mxu1 }
0x1089   :  { %2126 = vmatmul.mubr.msk.f32.vlgmr.msra.gmra.mrb[18].mxu0 %vm400_vm1, %v3111_v50 }
0x108a   :  { %2160 = vmatprep.mubr.msk.f32.mxu0 %vm2506_vm3, %v2503_v3  ;;  %vm1575_vm3 = vcmask 56320  }
0x108b   :  { %v2078_v61 = vpop.f32.mrb[24].mxu1 }
0x108c   :  { %v1373_v62 = vpop.f32.mrb[25].mxu1 }
0x1154   :  { %v1455_v1 = vpop.f32.mrb[16].mxu0 }
0x1155   :  { %v1456_v59 = vadd.f32 %v1455_v1, %v1385_v0  ;;  %v2089_v2 = vpop.f32.mrb[17].mxu0 }
0x1157   :  { %v1472_v60 = vadd.f32 %v2069_v40, %v1456_v59  ;;  %v1481_v4 = vadd.f32 %v1456_v59, %v1353_v54  ;;  %v1490_v5 = vadd.f32 %v2072_v51, %v1456_v59  ;;  %v1499_v6 = vadd.f32 %v1456_v59, %v1363_v58 }
0x1158   :  { %v1508_v8 = vadd.f32 %v2075_v57, %v1456_v59  ;;  %v1517_v9 = vadd.f32 %v1456_v59, %v1373_v62  ;;  %v1526_v10 = vadd.f32 %v2078_v61, %v1456_v59  ;;  %v1459_v14 = vadd.f32 %v1456_v59, %v1343_v7 }
0x1159   :  { %2477 = vtanh.f32 %v1472_v60 }
0x115a   :  { %2479 = vtanh.f32 %v1481_v4 }
0x115b   :  { %2481 = vtanh.f32 %v1490_v5 }
0x115c   :  { %v3125_v3 = vpop.f32.mrb[18].mxu0  ;;  %2483 = vtanh.f32 %v1499_v6 }
0x115d   :  { %v2127_v11 = vpop.f32.mrb[19].mxu0  ;;  %2485 = vtanh.f32 %v1508_v8 }
0x115e   :  { %2487 = vtanh.f32 %v1517_v9 }
0x115f   :  { %2489 = vtanh.f32 %v1459_v14 }
0x1160   :  { %2491 = vtanh.f32 %v1526_v10 }
0x1163   :  { %v2478_v20 = vpop.eup %2477 }
0x1164   :  { %v2480_v22 = vpop.eup %2479  ;;  %v1474_v23 = vmul.f32 %v2478_v20, %v1464_v19 }
0x1165   :  { %v2482_v36 = vpop.eup %2481  ;;  %v1483_v37 = vmul.f32 %v2480_v22, %v1464_v19 }
0x1166   :  { %v2484_v35 = vpop.eup %2483  ;;  %v1475_v41 = vsel %vm400_vm1, %v1474_v23, 0.0  ;;  %v1492_v38 = vmul.f32 %v2482_v36, %v1464_v19 }
0x1167   :  { %v2486_v42 = vpop.eup %2485  ;;  %1476 = vadd.xlane.f32.xlu1 %v1475_v41  ;;  %v1484_v55 = vsel %vm400_vm1, %v1483_v37, 0.0  ;;  %v1501_v18 = vmul.f32 %v2484_v35, %v1464_v19 }
0x1168   :  { %v2488_v16 = vpop.eup %2487  ;;  %1485 = vadd.xlane.f32.xlu0 %v1484_v55  ;;  %v1493_v53 = vsel %vm400_vm1, %v1492_v38, 0.0  ;;  %v1510_v27 = vmul.f32 %v2486_v42, %v1464_v19 }
0x1169   :  { %v1502_v48 = vsel %vm400_vm1, %v1501_v18, 0.0  ;;  %v1519_v28 = vmul.f32 %v2488_v16, %v1464_v19  ;;  %v2490_v49 = vpop.eup %2489  ;;  %v2514_v18 = vmov 1   ;;  %v2515_v16 = vmov 0  }
0x116a   :  { %v2492_v40 = vpop.eup %2491  ;;  %v1465_v7 = vmul.f32 %v2490_v49, %v1464_v19  ;;  %v1511_v44 = vsel %vm400_vm1, %v1510_v27, 0.0  ;;  %2419 = vset.pattern.permute.xlu1 %v2514_v18  ;;  %2418 = vset.pattern.permute.xlu0 %v2515_v16  ;;  %v2517_v27 = vmov 7  }
0x116b   :  { %1503 = vadd.xlane.f32.xlu1 %v1502_v48  ;;  %v1520_v43 = vsel %vm400_vm1, %v1519_v28, 0.0  ;;  %v1528_v46 = vmul.f32 %v2492_v40, %v1464_v19  ;;  %v2518_v40 = vmov 3  }
0x116c   :  { %1494 = vadd.xlane.f32.xlu0 %v1493_v53  ;;  %v1466_v51 = vsel %vm400_vm1, %v1465_v7, 0.0  ;;  %v2516_v53 = vmov 2   ;;  %v2520_v7 = vmov 5  }
0x116d   :  { %v1529_v52 = vsel %vm400_vm1, %v1528_v46, 0.0  ;;  %v3154_v46 = vld [vmem:[%s3299_s5 + $0x80] sm:$0x3] }
0x116f   :  { %1521 = vadd.xlane.f32.xlu1 %v1520_v43  ;;  %v2519_v43 = vmov 4  }
0x1170   :  { %1512 = vadd.xlane.f32.xlu0 %v1511_v44  ;;  %v2521_v44 = vmov 6  }
0x1173   :  { %1467 = vadd.xlane.f32.xlu1 %v1466_v51  ;;  %v1734_v51 = vrot.slane %v3154_v46, %v2775_v13  ;;  %v86_v13 = vld [vmem:[%s3299_s5 + $0x10] sm:$0xff] }
0x1174   :  { %1530 = vadd.xlane.f32.xlu0 %v1529_v52 }
0x1175   :  { %v3159_v52 = vadd.f32 %v3125_v3, %v1734_v51  ;;  %v87_v3 = vld [vmem:[%s3299_s5 + $0x18] sm:$0xff] }
0x11f4   :  { %v1477_v54 = vpop.xlane.xlu1 %1476 }
0x11f5   :  { %v1480_v57 = vsel %vm1479_vm4, %v1477_v54, -1e+10  ;;  %v1486_v58 = vpop.xlane.xlu0 %1485  ;;  %vm1577_vm4 = vcmask 64512   ;;  %v84_v54 = vld [vmem:[%s3299_s5] sm:$0xff] }
0x11f6   :  { %v1489_v61 = vsel %vm1488_vm5, %v1486_v58, -1e+10  ;;  %1536 = vrot.lane.b32.xlu0 %v1480_v57, %s2507_s29  ;;  %v85_v57 = vld [vmem:[%s3299_s5 + $0x8] sm:$0xff]  ;;  %vm1657_vm5 = vcmask 785408   ;;  %s2523_s29 = smov 96  }
0x11f7   :  { %1540 = vrot.lane.b32.xlu1 %v1489_v61, %s2508_s30  ;;  %v2342_v58 = vpack.c.bf16 %v85_v57, %v84_v54  ;;  %v2345_v61 = vpack.c.bf16 %v87_v3, %v86_v13  ;;  %v105_v54 = vld [vmem:[%s3302_s6 + $0x20] sm:$0xff]  ;;  %v106_v57 = vld [vmem:[%s3302_s6 + $0x28] sm:$0xff]  ;;  %v107_v3 = vld [vmem:[%s3302_s6 + $0x30] sm:$0xff] }
0x11f8   :  { %v1504_v62 = vpop.xlane.xlu1 %1503 }
0x11f9   :  { %v1495_v0 = vpop.xlane.xlu0 %1494  ;;  %v1507_v1 = vsel %vm1506_vm6, %v1504_v62, -1e+10  ;;  %2343 = vmatpush3.bf16.msra.mxu1 %v2342_v58  ;;  %v88_v62 = vld [vmem:[%s3299_s5 + $0x20] sm:$0xff]  ;;  %v2372_v58 = vpack.c.bf16 %v106_v57, %v105_v54 }
0x11fa   :  { %v1498_v59 = vsel %vm1497_vm7, %v1495_v0, -1e+10  ;;  %1548 = vrot.lane.b32.xlu0 %v1507_v1, %s2509_s10  ;;  %2344 = vmatprep.subr.bf16.mxu1 %v2505_v39  ;;  %v89_v0 = vld [vmem:[%s3299_s5 + $0x28] sm:$0xff] }
0x11fb   :  { %1544 = vrot.lane.b32.xlu1 %v1498_v59, %s2510_s11  ;;  %v2348_v1 = vpack.c.bf16 %v89_v0, %v88_v62  ;;  %v90_v59 = vld [vmem:[%s3299_s5 + $0x30] sm:$0xff]  ;;  %v109_v0 = vld [vmem:[%s3302_s6 + $0x40] sm:$0xff] }
0x11fc   :  { %v1522_v34 = vpop.xlane.xlu1 %1521 }
0x11fd   :  { %v1513_v12 = vpop.xlane.xlu0 %1512  ;;  %v1525_v2 = vsel %vm1524_vm8, %v1522_v34, -1e+10  ;;  %2346 = vmatpush3.bf16.msra.mxu1 %v2345_v61  ;;  %v91_v34 = vld [vmem:[%s3299_s5 + $0x38] sm:$0xff] }
0x11fe   :  { %v1516_v21 = vsel %vm1515_vm9, %v1513_v12, -1e+10  ;;  %1556 = vrot.lane.b32.xlu0 %v1525_v2, %s2511_s0  ;;  %2347 = vmatprep.subr.bf16.mxu1 %v2505_v39  ;;  %v2351_v12 = vpack.c.bf16 %v91_v34, %v90_v59  ;;  %v92_v2 = vld [vmem:[%s3299_s5 + $0x40] sm:$0xff]  ;;  %v108_v61 = vld [vmem:[%s3302_s6 + $0x38] sm:$0xff]  ;;  %v111_v34 = vld [vmem:[%s3302_s6 + $0x50] sm:$0xff] }
0x11ff   :  { %1552 = vrot.lane.b32.xlu1 %v1516_v21, %s2512_s12  ;;  %v93_v21 = vld [vmem:[%s3299_s5 + $0x48] sm:$0xff]  ;;  %v2375_v62 = vpack.c.bf16 %v108_v61, %v107_v3 }
0x1200   :  { %v1468_v4 = vpop.xlane.xlu1 %1467 }
0x1201   :  { %v1531_v47 = vpop.xlane.xlu0 %1530  ;;  %v1471_v5 = vsel %vm1470_vm11, %v1468_v4, -1e+10  ;;  %2349 = vmatpush3.bf16.msra.mxu1 %v2348_v1  ;;  %v110_v1 = vld [vmem:[%s3302_s6 + $0x48] sm:$0xff] }
0x1202   :  { %v1534_v60 = vsel %vm1533_vm10, %v1531_v47, -1e+10  ;;  %2350 = vmatprep.subr.bf16.mxu1 %v2505_v39  ;;  %v2354_v47 = vpack.c.bf16 %v93_v21, %v92_v2  ;;  %v2378_v59 = vpack.c.bf16 %v110_v1, %v109_v0  ;;  %v113_v21 = vld [vmem:[%s3302_s6 + $0x60] sm:$0xff] }
0x1203   :  { %1560 = vrot.lane.b32.xlu1 %v1534_v60, %s2513_s13  ;;  %v94_v60 = vld [vmem:[%s3299_s5 + $0x50] sm:$0xff]  ;;  %s2522_s5 = smov 32  }
0x1204   :  { %v2357_v4 = vpack.c.bf16 %v95_v63, %v94_v60  ;;  %v115_v63 = vld [vmem:[%s3302_s6 + $0x70] sm:$0xff] }
0x1205   :  { %2352 = vmatpush3.bf16.msra.mxu1 %v2351_v12  ;;  %v112_v12 = vld [vmem:[%s3302_s6 + $0x58] sm:$0xff] }
0x1206   :  { %2353 = vmatprep.subr.bf16.mxu1 %v2505_v39  ;;  %v2381_v2 = vpack.c.bf16 %v112_v12, %v111_v34 }
0x1209   :  { %2355 = vmatpush3.bf16.msra.mxu1 %v2354_v47  ;;  %v114_v47 = vld [vmem:[%s3302_s6 + $0x68] sm:$0xff] }
0x120a   :  { %2356 = vmatprep.subr.bf16.mxu1 %v2505_v39  ;;  %v2384_v60 = vpack.c.bf16 %v114_v47, %v113_v21 }
0x120d   :  { %2358 = vmatpush3.bf16.msra.mxu1 %v2357_v4  ;;  %v116_v4 = vld [vmem:[%s3302_s6 + $0x78] sm:$0xff] }
0x1268   :  { %v1537_v45 = vpop.permute.xlu0 %1536 }
0x1269   :  { %v1541_v6 = vpop.permute.xlu1 %1540  ;;  %v1564_v8 = vsel %vm1563_vm12, %v1471_v5, %v1537_v45 }
0x126a   :  { %v1566_v10 = vsel %vm1565_vm13, %v1564_v8, %v1541_v6 }
0x126c   :  { %v1549_v9 = vpop.permute.xlu0 %1548 }
0x126d   :  { %v1545_v15 = vpop.permute.xlu1 %1544 }
0x126e   :  { %v1568_v14 = vsel %vm1567_vm14, %v1566_v10, %v1545_v15 }
0x126f   :  { %v1570_v17 = vsel %vm1569_vm15, %v1568_v14, %v1549_v9 }
0x1270   :  { %v1557_v19 = vpop.permute.xlu0 %1556 }
0x1271   :  { %v1553_v11 = vpop.permute.xlu1 %1552 }
0x1272   :  { %v1572_v20 = vsel %vm1571_vm0, %v1570_v17, %v1553_v11 }
0x1273   :  { %v1574_v23 = vsel %vm1573_vm2, %v1572_v20, %v1557_v19 }
0x1275   :  { %v1561_v22 = vpop.permute.xlu1 %1560 }
0x1276   :  { %v1576_v36 = vsel %vm1575_vm3, %v1574_v23, %v1561_v22 }
0x1277   :  { %v1578_v37 = vsel %vm1577_vm4, %v1576_v36, -inf }
0x1278   :  { %1579 = vmax.xlane.f32.xlu0 %v1578_v37 }
0x1305   :  { %v1580_v35 = vpop.xlane.xlu0 %1579 }
0x1306   :  { %v1581_v41 = vsub.f32 %v1576_v36, %v1580_v35 }
0x1308   :  { %v1582_v42 = vmul.f32 1.442695, %v1581_v41 }
0x130a   :  { %2493 = vpow2.f32 %v1582_v42 }
0x1314   :  { %v2494_v55 = vpop.eup %2493 }
0x1315   :  { %v1584_v38 = vsel %vm1577_vm4, %v2494_v55, 0.0 }
0x1316   :  { %1585 = vadd.xlane.f32.xlu1 %v1584_v38 }
0x13a3   :  { %v1586_v48 = vpop.xlane.xlu1 %1585 }
0x13a4   :  { %2495 = vrcp.f32 %v1586_v48 }
0x13ae   :  { %v2496_v28 = vpop.eup %2495 }
0x13af   :  { %v1588_v49 = vmul.f32 %v2496_v28, %v2494_v55 }
0x13b1   :  { %1589 = vst.msk [vmem:[%s3300_s9] sm:$0xff] %vm1577_vm4, %v1588_v49  ;;  %1600 = vperm.xlu1 %2419, %v1588_v49   ;;  %1593 = vperm.xlu0 %2418, %v1588_v49  }
0x13b5   :  { %2420 = vset.pattern.permute.xlu1 %v2516_v53  ;;  %2426 = vset.pattern.permute.xlu0 %v2517_v27 }
0x13b6   :  { %1607 = vperm.xlu1 %2420, %v1588_v49  }
0x13ba   :  { %2421 = vset.pattern.permute.xlu1 %v2518_v40 }
0x13bb   :  { %1614 = vperm.xlu1 %2421, %v1588_v49  }
0x13bf   :  { %2422 = vset.pattern.permute.xlu1 %v2519_v43 }
0x13c0   :  { %1621 = vperm.xlu1 %2422, %v1588_v49  }
0x13c4   :  { %2423 = vset.pattern.permute.xlu1 %v2520_v7 }
0x13c5   :  { %1628 = vperm.xlu1 %2423, %v1588_v49  }
0x13c9   :  { %2424 = vset.pattern.permute.xlu1 %v2521_v44  ;;  %v102_v44 = vld [vmem:[%s3302_s6 + $0x8] sm:$0xff] }
0x13ca   :  { %1635 = vperm.xlu1 %2424, %v1588_v49  }
0x13ce   :  { %2425 = vset.pattern.permute.xlu1 %v2517_v27 }
0x13cf   :  { %1642 = vperm.xlu1 %2425, %v1588_v49  }
0x13d3   :  { %1813 = vrot.lane.b32.xlu1 %v3159_v52, %s2504_s25 }
0x1430   :  { %v1601_v45 = vpop.permute.xlu1 %1600  ;;  %v1594_v8 = vpop.permute.xlu0 %1593 }
0x1431   :  { %v1603_v10 = vmul.f32 %v1601_v45, %v3051_v25  ;;  %v1596_v15 = vmul.f32 %v1594_v8, %v3047_v24  ;;  %v2387_v45 = vpack.c.bf16 %v116_v4, %v115_v63 }
0x1433   :  { %v1604_v11 = vadd.f32 %v1603_v10, %v1596_v15 }
0x1435   :  { %v1608_v5 = vpop.permute.xlu1 %1607 }
0x1436   :  { %v1610_v14 = vmul.f32 %v1608_v5, %v3055_v26 }
0x1438   :  { %v1611_v20 = vadd.f32 %v1610_v14, %v1604_v11  ;;  %v1966_v11 = vld [vmem:[%s3302_s6 + $0x80] ss:$0 sm:$0xff] }
0x143a   :  { %v1615_v6 = vpop.permute.xlu1 %1614 }
0x143b   :  { %v1617_v19 = vmul.f32 %v1615_v6, %v3059_v29  ;;  %v1647_v29 = vld [vmem:[%s3301_s2] sm:$0xff] }
0x143d   :  { %v1618_v23 = vadd.f32 %v1617_v19, %v1611_v20 }
0x143f   :  { %v1622_v9 = vpop.permute.xlu1 %1621 }
0x1440   :  { %v1624_v22 = vmul.f32 %v1622_v9, %v3063_v30 }
0x1442   :  { %v1625_v35 = vadd.f32 %v1624_v22, %v1618_v23 }
0x1444   :  { %v1629_v17 = vpop.permute.xlu1 %1628 }
0x1445   :  { %v1631_v36 = vmul.f32 %v1629_v17, %v3067_v33 }
0x1447   :  { %v1632_v42 = vadd.f32 %v1631_v36, %v1625_v35 }
0x1449   :  { %v1636_v37 = vpop.permute.xlu1 %1635 }
0x144a   :  { %v1638_v41 = vmul.f32 %v1636_v37, %v3071_v31  ;;  %v1656_v31 = vrot.slane %v3154_v46, %v2744_v56  ;;  %v101_v56 = vld [vmem:[%s3302_s6] sm:$0xff]  ;;  %v103_v46 = vld [vmem:[%s3302_s6 + $0x10] sm:$0xff] }
0x144b   :  { %v2366_v51 = vpack.c.bf16 %v102_v44, %v101_v56 }
0x144c   :  { %v1639_v55 = vadd.f32 %v1638_v41, %v1632_v42 }
0x144d   :  { %2367 = vmatpush3.bf16.msra.mxu0 %v2366_v51 }
0x144e   :  { %v1643_v25 = vpop.permute.xlu1 %1642  ;;  %2368 = vmatprep.subr.bf16.mxu0 %v2505_v39 }
0x144f   :  { %v1645_v24 = vmul.f32 %v1643_v25, %v3075_v32 }
0x1451   :  { %v1646_v26 = vadd.f32 %v1645_v24, %v1639_v55 }
0x1452   :  { %v1814_v27 = vpop.permute.xlu1 %1813 }
0x1453   :  { %1649 = vrot.lane.b32.xlu0 %v1646_v26, %s2522_s5 }
0x14c5   :  { %v1650_v30 = vpop.permute.xlu0 %1649 }
0x14c6   :  { %v3216_v33 = vsel %vm400_vm1, %v1647_v29, %v1650_v30 }
0x14c7   :  { %2115 = vmatmul.mubr.msk.f32.vlgmr.msra.gmra.mrb[26].mxu1 %vm1657_vm5, %v3216_v33 }
0x159a   :  { %v1727_v38 = vpop.f32.mrb[26].mxu1 }
0x159b   :  { %v1728_v32 = vadd.f32 %v1727_v38, %v1656_v31  ;;  %v2116_v18 = vpop.f32.mrb[27].mxu1 }
0x159d   :  { %v1805_v16 = vadd.f32 %v3159_v52, %v1728_v32 }
0x159f   :  { %v1965_v48 = vmul.f32 -1.442695, %v1805_v16 }
0x15a1   :  { %2497 = vpow2.f32 %v1965_v48 }
0x15ab   :  { %v2498_v28 = vpop.eup %2497 }
0x15ac   :  { %v1809_v49 = vadd.f32 1.0, %v2498_v28 }
0x15ae   :  { %2499 = vrcp.f32 %v1809_v49 }
0x15b8   :  { %v2500_v53 = vpop.eup %2499 }
0x15b9   :  { %v1816_v40 = vmul.f32 %v2500_v53, %v1814_v27  ;;  %v1823_v6 = vsub.f32 1.0, %v2500_v53 }
0x15bb   :  { %1818 = vrot.lane.b32.xlu0 %v1816_v40, %s2504_s25 }
0x15bf   :  { %1829 = vrot.lane.b32.xlu0 %v3111_v50, %s2522_s5  ;;  %v104_v50 = vld [vmem:[%s3302_s6 + $0x18] sm:$0xff] }
0x15c0   :  { %v2369_v52 = vpack.c.bf16 %v104_v50, %v103_v46 }
0x15c2   :  { %2370 = vmatpush3.bf16.msra.mxu0 %v2369_v52 }
0x15c3   :  { %2371 = vmatprep.subr.bf16.mxu0 %v2505_v39 }
0x15c6   :  { %2373 = vmatpush3.bf16.msra.mxu0 %v2372_v58 }
0x15c7   :  { %2374 = vmatprep.subr.bf16.mxu0 %v2505_v39 }
0x15ca   :  { %2376 = vmatpush3.bf16.msra.mxu0 %v2375_v62 }
0x15cb   :  { %2377 = vmatprep.subr.bf16.mxu0 %v2505_v39 }
0x15ce   :  { %2379 = vmatpush3.bf16.msra.mxu0 %v2378_v59 }
0x15cf   :  { %2380 = vmatprep.subr.bf16.mxu0 %v2505_v39 }
0x15d2   :  { %2382 = vmatpush3.bf16.msra.mxu0 %v2381_v2 }
0x15d3   :  { %2383 = vmatprep.subr.bf16.mxu0 %v2505_v39 }
0x15d6   :  { %2385 = vmatpush3.bf16.msra.mxu0 %v2384_v60 }
0x15d7   :  { %2386 = vmatprep.subr.bf16.mxu0 %v2505_v39 }
0x15da   :  { %2388 = vmatpush3.bf16.msra.mxu0 %v2387_v45 }
0x162d   :  { %v1819_v43 = vpop.permute.xlu0 %1818 }
0x162e   :  { %v1821_v7 = vadd.f32 %v1819_v43, %v1728_v32 }
0x1630   :  { %2501 = vtanh.f32 %v1821_v7 }
0x1631   :  { %v1830_v5 = vpop.permute.xlu0 %1829 }
0x1632   :  { %v1832_v9 = vmul.f32 %v2500_v53, %v1830_v5 }
0x163a   :  { %v2502_v13 = vpop.eup %2501 }
0x163b   :  { %1825 = vrot.lane.b32.xlu1 %v2502_v13, %s2523_s29 }
0x16ad   :  { %v1826_v8 = vpop.permute.xlu1 %1825 }
0x16ae   :  { %v1828_v10 = vmul.f32 %v1826_v8, %v1823_v6 }
0x16b0   :  { %v1833_v15 = vadd.f32 %v1832_v9, %v1828_v10 }
0x16b2   :  { %1914 = vrot.lane.b32.xlu0 %v1833_v15, %s2523_s29  ;;  %1835 = vrot.lane.b32.xlu1 %v1833_v15, %s2504_s25 }
0x1724   :  { %v1915_v14 = vpop.permute.xlu0 %1914  ;;  %v1836_v17 = vpop.permute.xlu1 %1835 }
0x1725   :  { %1917 = vst.msk [vmem:[%s3303_s8] sm:$0xff] %vm400_vm1, %v1915_v14  ;;  %v1838_v39 = vsel %vm1657_vm5, %v3216_v33, %v1836_v17 }
0x1726   :  { %2161 = vmatmul.mubr.f32.vlgmr.msra.gmra.mrb[20].mxu0 %v1838_v39 }
0x17f9   :  { %v1909_v19 = vpop.f32.mrb[20].mxu0 }
0x17fa   :  { %v1910_v20 = vadd.f32 %v1966_v11, %v1909_v19  ;;  %v2162_v22 = vpop.f32.mrb[21].mxu0 }
0x17fc   :  { %1913 = vst [vmem:[%s3304_s7] sm:$0xff] %v1910_v20 }

</bundles_post_ra>
